<compile_context>
chip_gen: v6e
topology: v6e:2x2x1
jax: 0.10.0
libtpu: 0.0.40
codegen_flags: <defaults>
</compile_context>

<pallas_src>
import functools

import jax
import jax.numpy as jnp
from jax.experimental import pallas as pl
from jax.experimental.pallas import tpu as pltpu

_LANES = 128


# ----------------------------- Pallas kernel ------------------------------ #
def _ar_flow_kernel(x_ref, z_ref, p_ref, y_ref, *, seq_len: int, hidden: int):
    """Fused T-step (GRUCell -> MLP -> affine flow update) recurrence."""
    B = x_ref.shape[0]
    T = seq_len
    H = hidden            # 32
    G = 3 * H             # 96 (gate width)

    # ---- one-time parameter loads from the packed slab (aligned block loads) ----
    hdr = p_ref[0:8, :]                         # [8, 128] header block
    wih0 = hdr[0:1, 0:G]                        # [1, 96] row 0 of W_ih^T
    wih1 = hdr[1:2, 0:G]                        # [1, 96] row 1 of W_ih^T
    b_rz = hdr[2:3, 0:2 * H]                    # [1, 64] (b_ih + b_hh)[:64]
    b_in = hdr[2:3, 2 * H:G]                    # [1, 32] b_ih[64:96]
    b_hn = hdr[2:3, G:G + H]                    # [1, 32] b_hh[64:96]
    b1_row = hdr[3:4, :]                        # [1, 128] MLP bias1 at lanes 96:128
    b2_row = hdr[4:5, :]                        # [1, 128] MLP bias2 at lanes 0:4

    w_cat = p_ref[8:8 + H, :]                   # [32, 128] = [W_hh^T | W1^T]
    w2big = p_ref[8 + H:8 + H + _LANES, :]      # [128, 128]; rows 96:128, cols 0:4 = W2^T

    xf = x_ref[...]                             # [B, T*D] noise, loaded once
    h = z_ref[...].astype(jnp.float32)          # [B, H] GRU hidden state
    y_tm1 = jnp.zeros((B, 2), dtype=jnp.float32)

    # Seed the pipelined recurrence: gh for step 0 (lanes 0:96 are h0 @ W_hh^T).
    gh_carry = jnp.dot(h, w_cat, preferred_element_type=jnp.float32)   # [B, 128]

    # T is small & static -> unrolled loop (traced once).
    for t in range(T):
        x_t = xf[:, 2 * t:2 * t + 2]                                    # [B, 2]

        # ---- GRUCell (PyTorch gate order r, z, n) ----
        # Input-to-hidden matmul (K=2) as a rank-2 outer product on the VPU.
        gi = y_tm1[:, 0:1] * wih0 + y_tm1[:, 1:2] * wih1                # [B, 96]
        gh = gh_carry                                                   # [B, 128] (gates in 0:96)

        rz = jax.nn.sigmoid(gi[:, 0:2 * H] + gh[:, 0:2 * H] + b_rz)     # [B, 64]
        r = rz[:, 0:H]
        zg = rz[:, H:2 * H]
        n = jnp.tanh(gi[:, 2 * H:G] + b_in + r * (gh[:, 2 * H:G] + b_hn))
        h = (1.0 - zg) * n + zg * h                                     # [B, H]

        # ---- fused (W_hh | W1) matmul: gh for step t+1 and MLP pre-activation ----
        comb = jnp.dot(h, w_cat, preferred_element_type=jnp.float32)    # [B, 128]
        gh_carry = comb

        # ---- MLP: ReLU then Linear(32 -> 4), W2 embedded at lanes 96:128 ----
        hid = jnp.maximum(comb + b1_row, 0.0)                           # [B, 128] (96:128 valid)
        dls = jnp.dot(hid, w2big, preferred_element_type=jnp.float32) + b2_row  # [B, 128] (0:4 valid)

        dloc = dls[:, 0:2]
        scale = jax.nn.softplus(dls[:, 2:4]) + 0.001
        y_t = y_tm1 + dloc + scale * x_t                                # [B, 2]

        # Lane-dense output slab: static-offset store into the [B, T*D] VMEM block,
        # written back to HBM as one contiguous DMA at kernel end.
        y_ref[:, 2 * t:2 * t + 2] = y_t
        y_tm1 = y_t


# ------------------------------ Wrapper ----------------------------------- #
def _pack_params(params, H):
    """Pack all weights/biases into a single [168, 128] f32 slab (one DMA)."""
    G = 3 * H
    wih_t = params["w_ih"].T.astype(jnp.float32)     # [2, 96]
    whh_t = params["w_hh"].T.astype(jnp.float32)     # [32, 96]
    w1_t = params["w1"].T.astype(jnp.float32)        # [32, 32]
    w2_t = params["w2"].T.astype(jnp.float32)        # [32, 4]
    bih = params["b_ih"].astype(jnp.float32)
    bhh = params["b_hh"].astype(jnp.float32)

    n_rows = 8 + H + _LANES                          # 8 header + 32 + 128 = 168
    slab = jnp.zeros((n_rows, _LANES), jnp.float32)
    # header
    slab = slab.at[0, :G].set(wih_t[0])
    slab = slab.at[1, :G].set(wih_t[1])
    slab = slab.at[2, :2 * H].set(bih[:2 * H] + bhh[:2 * H])   # fused r/z biases
    slab = slab.at[2, 2 * H:G].set(bih[2 * H:])                # b_in
    slab = slab.at[2, G:G + H].set(bhh[2 * H:])                # b_hn
    slab = slab.at[3, G:G + 32].set(params["b1"].astype(jnp.float32))   # lanes 96:128
    slab = slab.at[4, :4].set(params["b2"].astype(jnp.float32))         # lanes 0:4
    # fused recurrence weights  [W_hh^T | W1^T]
    slab = slab.at[8:8 + H, :G].set(whh_t)
    slab = slab.at[8:8 + H, G:G + 32].set(w1_t)
    # W2^T embedded at rows 96:128 of a [128, 128] block
    slab = slab.at[8 + H + G:8 + H + _LANES, :4].set(w2_t)
    return slab


@jax.jit
def autoregressive_flow_forward(x, z, params):
    """x ~ N(0, I) noise [B, T, D], z context [B, H]  ->  y [B, T, D]."""
    B, T, D = x.shape
    H = z.shape[1]
    assert D == 2 and H == 32, "packed kernel layout assumes output dim 2, hidden 32"

    x_flat = x.reshape(B, T * D).astype(jnp.float32)   # lane-dense input slab
    slab = _pack_params(params, H)

    kernel = functools.partial(_ar_flow_kernel, seq_len=T, hidden=H)
    vmem = pl.BlockSpec(memory_space=pltpu.MemorySpace.VMEM)

    y_flat = pl.pallas_call(
        kernel,
        out_shape=jax.ShapeDtypeStruct((B, T * D), jnp.float32),
        in_specs=[vmem, vmem, vmem],
        out_specs=vmem,
    )(x_flat, z.astype(jnp.float32), slab)
    return y_flat.reshape(B, T, D)


# -------------------------- Pure-JAX reference ----------------------------- #
def _reference_forward(x, z, params):
    B, T, D = x.shape
    H = z.shape[1]
    h = z
    y_tm1 = jnp.zeros((B, D), jnp.float32)
    ys = []
    for t in range(T):
        x_t = x[:, t, :]
        gi = y_tm1 @ params["w_ih"].T + params["b_ih"]
        gh = h @ params["w_hh"].T + params["b_hh"]
        i_r, i_z, i_n = gi[:, :H], gi[:, H:2 * H], gi[:, 2 * H:]
        h_r, h_z, h_n = gh[:, :H], gh[:, H:2 * H], gh[:, 2 * H:]
        r = jax.nn.sigmoid(i_r + h_r)
        zg = jax.nn.sigmoid(i_z + h_z)
        n = jnp.tanh(i_n + r * h_n)
        h = (1.0 - zg) * n + zg * h
        hid = jax.nn.relu(h @ params["w1"].T + params["b1"])
        dls = hid @ params["w2"].T + params["b2"]
        dloc = dls[:, :2]
        scale = jax.nn.softplus(dls[:, 2:]) + 0.001
        y_t = y_tm1 + dloc + scale * x_t
        ys.append(y_t)
        y_tm1 = y_t
    return jnp.stack(ys, axis=-2)


# ------------------------------- Main -------------------------------------- #
if __name__ == "__main__":
    # Small shapes consistent with the module: output_shape = (T, 2), hidden=32.
    B, T, D, H = 8, 8, 2, 32

    key = jax.random.PRNGKey(0)
    keys = jax.random.split(key, 10)

    # Deterministic synthetic parameters (PyTorch layout conventions).
    params = {
        "w_ih": 0.1 * jax.random.normal(keys[0], (3 * H, D), jnp.float32),
        "w_hh": 0.1 * jax.random.normal(keys[1], (3 * H, H), jnp.float32),
        "b_ih": 0.1 * jax.random.normal(keys[2], (3 * H,), jnp.float32),
        "b_hh": 0.1 * jax.random.normal(keys[3], (3 * H,), jnp.float32),
        "w1": 0.1 * jax.random.normal(keys[4], (32, H), jnp.float32),
        "b1": 0.1 * jax.random.normal(keys[5], (32,), jnp.float32),
        "w2": 0.1 * jax.random.normal(keys[6], (4, 32), jnp.float32),
        "b2": 0.1 * jax.random.normal(keys[7], (4,), jnp.float32),
    }

    # Context z: [B, H]; base-distribution sample x ~ N(0, I): [B, T, D]
    # (MultivariateNormal with zero mean and identity scale_tril == standard normal).
    # TODO(synk): base-dist sampling & logabsdet stay in plain JAX; module.forward only returns y.
    z = jax.random.normal(keys[8], (B, H), jnp.float32)
    x = jax.random.normal(keys[9], (B, T * D), jnp.float32).reshape(B, T, D)

    y = autoregressive_flow_forward(x, z, params)
    y = jax.block_until_ready(y)

    y_ref = _reference_forward(x, z, params)
    assert y.shape == (B, T, D)
    assert jnp.allclose(y, y_ref, atol=1e-5, rtol=1e-5), "mismatch vs JAX reference"

    print("KERNEL_OK")
</pallas_src>

<mosaic_0001>
module attributes {stable_mosaic.version = 11 : i64} {
  func.func @_ar_flow_kernel(%arg0: memref<8x16xf32, #tpu.memory_space<vmem>>, %arg1: memref<8x32xf32, #tpu.memory_space<vmem>>, %arg2: memref<168x128xf32, #tpu.memory_space<vmem>>, %arg3: memref<8x16xf32, #tpu.memory_space<vmem>>) attributes {dimension_semantics = [], scalar_prefetch = 0 : i64, scratch_operands = 0 : i64, tpu.core_type = #tpu.core_type<tc>} {
    %c0 = arith.constant 0 : index
    %c0_0 = arith.constant 0 : index
    %0 = vector.load %arg2[%c0, %c0_0] : memref<168x128xf32, #tpu.memory_space<vmem>>, vector<8x128xf32>
    %1 = vector.extract_strided_slice %0 {offsets = [0, 0], sizes = [1, 96], strides = [1, 1]} : vector<8x128xf32> to vector<1x96xf32>
    %2 = vector.extract_strided_slice %0 {offsets = [1, 0], sizes = [1, 96], strides = [1, 1]} : vector<8x128xf32> to vector<1x96xf32>
    %3 = vector.extract_strided_slice %0 {offsets = [2, 0], sizes = [1, 64], strides = [1, 1]} : vector<8x128xf32> to vector<1x64xf32>
    %4 = vector.extract_strided_slice %0 {offsets = [2, 64], sizes = [1, 32], strides = [1, 1]} : vector<8x128xf32> to vector<1x32xf32>
    %5 = vector.extract_strided_slice %0 {offsets = [2, 96], sizes = [1, 32], strides = [1, 1]} : vector<8x128xf32> to vector<1x32xf32>
    %6 = vector.extract_strided_slice %0 {offsets = [3, 0], sizes = [1, 128], strides = [1, 1]} : vector<8x128xf32> to vector<1x128xf32>
    %7 = vector.extract_strided_slice %0 {offsets = [4, 0], sizes = [1, 128], strides = [1, 1]} : vector<8x128xf32> to vector<1x128xf32>
    %c8 = arith.constant 8 : index
    %c0_1 = arith.constant 0 : index
    %8 = vector.load %arg2[%c8, %c0_1] : memref<168x128xf32, #tpu.memory_space<vmem>>, vector<32x128xf32>
    %c40 = arith.constant 40 : index
    %c0_2 = arith.constant 0 : index
    %9 = vector.load %arg2[%c40, %c0_2] : memref<168x128xf32, #tpu.memory_space<vmem>>, vector<128x128xf32>
    %c0_3 = arith.constant 0 : index
    %c0_4 = arith.constant 0 : index
    %10 = vector.load %arg0[%c0_3, %c0_4] : memref<8x16xf32, #tpu.memory_space<vmem>>, vector<8x16xf32>
    %c0_5 = arith.constant 0 : index
    %c0_6 = arith.constant 0 : index
    %11 = vector.load %arg1[%c0_5, %c0_6] : memref<8x32xf32, #tpu.memory_space<vmem>>, vector<8x32xf32>
    %cst = arith.constant 0.000000e+00 : f32
    %12 = vector.broadcast %cst : f32 to vector<8x2xf32>
    %cst_7 = arith.constant dense<0.000000e+00> : vector<8x128xf32>
    %13 = tpu.matmul %11, %8, %cst_7 {dimension_numbers = #tpu.dot_dimension_numbers<[1], [0], [0], [1], [0, 0, 1, 1], [], []>} : vector<8x32xf32>, vector<32x128xf32>, vector<8x128xf32> -> vector<8x128xf32>
    %14 = vector.extract_strided_slice %10 {offsets = [0, 0], sizes = [8, 2], strides = [1, 1]} : vector<8x16xf32> to vector<8x2xf32>
    %15 = vector.extract_strided_slice %12 {offsets = [0, 0], sizes = [8, 1], strides = [1, 1]} : vector<8x2xf32> to vector<8x1xf32>
    %16 = vector.broadcast %15 : vector<8x1xf32> to vector<8x96xf32>
    %17 = vector.broadcast %1 : vector<1x96xf32> to vector<8x96xf32>
    %18 = arith.mulf %16, %17 : vector<8x96xf32>
    %19 = vector.extract_strided_slice %12 {offsets = [0, 1], sizes = [8, 1], strides = [1, 1]} : vector<8x2xf32> to vector<8x1xf32>
    %20 = vector.broadcast %19 : vector<8x1xf32> to vector<8x96xf32>
    %21 = vector.broadcast %2 : vector<1x96xf32> to vector<8x96xf32>
    %22 = arith.mulf %20, %21 : vector<8x96xf32>
    %23 = arith.addf %18, %22 : vector<8x96xf32>
    %24 = vector.extract_strided_slice %23 {offsets = [0, 0], sizes = [8, 64], strides = [1, 1]} : vector<8x96xf32> to vector<8x64xf32>
    %25 = vector.extract_strided_slice %13 {offsets = [0, 0], sizes = [8, 64], strides = [1, 1]} : vector<8x128xf32> to vector<8x64xf32>
    %26 = arith.addf %24, %25 : vector<8x64xf32>
    %27 = vector.broadcast %3 : vector<1x64xf32> to vector<8x64xf32>
    %28 = arith.addf %26, %27 : vector<8x64xf32>
    %29 = arith.negf %28 : vector<8x64xf32>
    %30 = math.exp %29 : vector<8x64xf32>
    %cst_8 = arith.constant 1.000000e+00 : f32
    %31 = vector.broadcast %cst_8 : f32 to vector<8x64xf32>
    %32 = arith.addf %31, %30 : vector<8x64xf32>
    %33 = arith.divf %31, %32 : vector<8x64xf32>
    %34 = vector.extract_strided_slice %33 {offsets = [0, 0], sizes = [8, 32], strides = [1, 1]} : vector<8x64xf32> to vector<8x32xf32>
    %35 = vector.extract_strided_slice %33 {offsets = [0, 32], sizes = [8, 32], strides = [1, 1]} : vector<8x64xf32> to vector<8x32xf32>
    %36 = vector.extract_strided_slice %23 {offsets = [0, 64], sizes = [8, 32], strides = [1, 1]} : vector<8x96xf32> to vector<8x32xf32>
    %37 = vector.broadcast %4 : vector<1x32xf32> to vector<8x32xf32>
    %38 = arith.addf %36, %37 : vector<8x32xf32>
    %39 = vector.extract_strided_slice %13 {offsets = [0, 64], sizes = [8, 32], strides = [1, 1]} : vector<8x128xf32> to vector<8x32xf32>
    %40 = vector.broadcast %5 : vector<1x32xf32> to vector<8x32xf32>
    %41 = arith.addf %39, %40 : vector<8x32xf32>
    %42 = arith.mulf %34, %41 : vector<8x32xf32>
    %43 = arith.addf %38, %42 : vector<8x32xf32>
    %44 = math.tanh %43 : vector<8x32xf32>
    %cst_9 = arith.constant 1.000000e+00 : f32
    %45 = vector.broadcast %cst_9 : f32 to vector<8x32xf32>
    %46 = arith.subf %45, %35 : vector<8x32xf32>
    %47 = arith.mulf %46, %44 : vector<8x32xf32>
    %48 = arith.mulf %35, %11 : vector<8x32xf32>
    %49 = arith.addf %47, %48 : vector<8x32xf32>
    %cst_10 = arith.constant dense<0.000000e+00> : vector<8x128xf32>
    %50 = tpu.matmul %49, %8, %cst_10 {dimension_numbers = #tpu.dot_dimension_numbers<[1], [0], [0], [1], [0, 0, 1, 1], [], []>} : vector<8x32xf32>, vector<32x128xf32>, vector<8x128xf32> -> vector<8x128xf32>
    %51 = vector.broadcast %6 : vector<1x128xf32> to vector<8x128xf32>
    %52 = arith.addf %50, %51 : vector<8x128xf32>
    %cst_11 = arith.constant 0.000000e+00 : f32
    %53 = vector.broadcast %cst_11 : f32 to vector<8x128xf32>
    %54 = arith.maximumf %52, %53 : vector<8x128xf32>
    %cst_12 = arith.constant dense<0.000000e+00> : vector<8x128xf32>
    %55 = tpu.matmul %54, %9, %cst_12 {dimension_numbers = #tpu.dot_dimension_numbers<[1], [0], [0], [1], [0, 0, 1, 1], [], []>} : vector<8x128xf32>, vector<128x128xf32>, vector<8x128xf32> -> vector<8x128xf32>
    %56 = vector.broadcast %7 : vector<1x128xf32> to vector<8x128xf32>
    %57 = arith.addf %55, %56 : vector<8x128xf32>
    %58 = vector.extract_strided_slice %57 {offsets = [0, 0], sizes = [8, 2], strides = [1, 1]} : vector<8x128xf32> to vector<8x2xf32>
    %59 = vector.extract_strided_slice %57 {offsets = [0, 2], sizes = [8, 2], strides = [1, 1]} : vector<8x128xf32> to vector<8x2xf32>
    %cst_13 = arith.constant 0.000000e+00 : f32
    %60 = vector.broadcast %cst_13 : f32 to vector<8x2xf32>
    %61 = arith.maximumf %59, %60 : vector<8x2xf32>
    %62 = vector.broadcast %cst_13 : f32 to vector<8x2xf32>
    %63 = arith.subf %59, %62 : vector<8x2xf32>
    %64 = arith.cmpf one, %63, %63 : vector<8x2xf32>
    %65 = vector.broadcast %cst_13 : f32 to vector<8x2xf32>
    %66 = arith.addf %59, %65 : vector<8x2xf32>
    %67 = math.absf %63 : vector<8x2xf32>
    %cst_14 = arith.constant 0.000000e+00 : f32
    %68 = vector.broadcast %cst_14 : f32 to vector<8x2xf32>
    %69 = arith.subf %68, %67 : vector<8x2xf32>
    %70 = math.exp %69 : vector<8x2xf32>
    %71 = math.log1p %70 : vector<8x2xf32>
    %72 = arith.addf %61, %71 : vector<8x2xf32>
    %73 = arith.select %64, %66, %72 : vector<8x2xi1>, vector<8x2xf32>
    %cst_15 = arith.constant 1.000000e-03 : f32
    %74 = vector.broadcast %cst_15 : f32 to vector<8x2xf32>
    %75 = arith.addf %73, %74 : vector<8x2xf32>
    %76 = arith.addf %12, %58 : vector<8x2xf32>
    %77 = arith.mulf %75, %14 : vector<8x2xf32>
    %78 = arith.addf %76, %77 : vector<8x2xf32>
    %c0_16 = arith.constant 0 : index
    %c0_17 = arith.constant 0 : index
    %79 = vector.load %arg3[%c0_16, %c0_17] : memref<8x16xf32, #tpu.memory_space<vmem>>, vector<8x2xf32>
    tpu.vector_store %arg3[%c0_16, %c0_17], %78 {strides = array<i32>} : memref<8x16xf32, #tpu.memory_space<vmem>>, vector<8x2xf32>,
    %80 = vector.extract_strided_slice %10 {offsets = [0, 2], sizes = [8, 2], strides = [1, 1]} : vector<8x16xf32> to vector<8x2xf32>
    %81 = vector.extract_strided_slice %78 {offsets = [0, 0], sizes = [8, 1], strides = [1, 1]} : vector<8x2xf32> to vector<8x1xf32>
    %82 = vector.broadcast %81 : vector<8x1xf32> to vector<8x96xf32>
    %83 = vector.broadcast %1 : vector<1x96xf32> to vector<8x96xf32>
    %84 = arith.mulf %82, %83 : vector<8x96xf32>
    %85 = vector.extract_strided_slice %78 {offsets = [0, 1], sizes = [8, 1], strides = [1, 1]} : vector<8x2xf32> to vector<8x1xf32>
    %86 = vector.broadcast %85 : vector<8x1xf32> to vector<8x96xf32>
    %87 = vector.broadcast %2 : vector<1x96xf32> to vector<8x96xf32>
    %88 = arith.mulf %86, %87 : vector<8x96xf32>
    %89 = arith.addf %84, %88 : vector<8x96xf32>
    %90 = vector.extract_strided_slice %89 {offsets = [0, 0], sizes = [8, 64], strides = [1, 1]} : vector<8x96xf32> to vector<8x64xf32>
    %91 = vector.extract_strided_slice %50 {offsets = [0, 0], sizes = [8, 64], strides = [1, 1]} : vector<8x128xf32> to vector<8x64xf32>
    %92 = arith.addf %90, %91 : vector<8x64xf32>
    %93 = vector.broadcast %3 : vector<1x64xf32> to vector<8x64xf32>
    %94 = arith.addf %92, %93 : vector<8x64xf32>
    %95 = arith.negf %94 : vector<8x64xf32>
    %96 = math.exp %95 : vector<8x64xf32>
    %cst_18 = arith.constant 1.000000e+00 : f32
    %97 = vector.broadcast %cst_18 : f32 to vector<8x64xf32>
    %98 = arith.addf %97, %96 : vector<8x64xf32>
    %99 = arith.divf %97, %98 : vector<8x64xf32>
    %100 = vector.extract_strided_slice %99 {offsets = [0, 0], sizes = [8, 32], strides = [1, 1]} : vector<8x64xf32> to vector<8x32xf32>
    %101 = vector.extract_strided_slice %99 {offsets = [0, 32], sizes = [8, 32], strides = [1, 1]} : vector<8x64xf32> to vector<8x32xf32>
    %102 = vector.extract_strided_slice %89 {offsets = [0, 64], sizes = [8, 32], strides = [1, 1]} : vector<8x96xf32> to vector<8x32xf32>
    %103 = vector.broadcast %4 : vector<1x32xf32> to vector<8x32xf32>
    %104 = arith.addf %102, %103 : vector<8x32xf32>
    %105 = vector.extract_strided_slice %50 {offsets = [0, 64], sizes = [8, 32], strides = [1, 1]} : vector<8x128xf32> to vector<8x32xf32>
    %106 = vector.broadcast %5 : vector<1x32xf32> to vector<8x32xf32>
    %107 = arith.addf %105, %106 : vector<8x32xf32>
    %108 = arith.mulf %100, %107 : vector<8x32xf32>
    %109 = arith.addf %104, %108 : vector<8x32xf32>
    %110 = math.tanh %109 : vector<8x32xf32>
    %cst_19 = arith.constant 1.000000e+00 : f32
    %111 = vector.broadcast %cst_19 : f32 to vector<8x32xf32>
    %112 = arith.subf %111, %101 : vector<8x32xf32>
    %113 = arith.mulf %112, %110 : vector<8x32xf32>
    %114 = arith.mulf %101, %49 : vector<8x32xf32>
    %115 = arith.addf %113, %114 : vector<8x32xf32>
    %cst_20 = arith.constant dense<0.000000e+00> : vector<8x128xf32>
    %116 = tpu.matmul %115, %8, %cst_20 {dimension_numbers = #tpu.dot_dimension_numbers<[1], [0], [0], [1], [0, 0, 1, 1], [], []>} : vector<8x32xf32>, vector<32x128xf32>, vector<8x128xf32> -> vector<8x128xf32>
    %117 = vector.broadcast %6 : vector<1x128xf32> to vector<8x128xf32>
    %118 = arith.addf %116, %117 : vector<8x128xf32>
    %cst_21 = arith.constant 0.000000e+00 : f32
    %119 = vector.broadcast %cst_21 : f32 to vector<8x128xf32>
    %120 = arith.maximumf %118, %119 : vector<8x128xf32>
    %cst_22 = arith.constant dense<0.000000e+00> : vector<8x128xf32>
    %121 = tpu.matmul %120, %9, %cst_22 {dimension_numbers = #tpu.dot_dimension_numbers<[1], [0], [0], [1], [0, 0, 1, 1], [], []>} : vector<8x128xf32>, vector<128x128xf32>, vector<8x128xf32> -> vector<8x128xf32>
    %122 = vector.broadcast %7 : vector<1x128xf32> to vector<8x128xf32>
    %123 = arith.addf %121, %122 : vector<8x128xf32>
    %124 = vector.extract_strided_slice %123 {offsets = [0, 0], sizes = [8, 2], strides = [1, 1]} : vector<8x128xf32> to vector<8x2xf32>
    %125 = vector.extract_strided_slice %123 {offsets = [0, 2], sizes = [8, 2], strides = [1, 1]} : vector<8x128xf32> to vector<8x2xf32>
    %cst_23 = arith.constant 0.000000e+00 : f32
    %126 = vector.broadcast %cst_23 : f32 to vector<8x2xf32>
    %127 = arith.maximumf %125, %126 : vector<8x2xf32>
    %128 = vector.broadcast %cst_23 : f32 to vector<8x2xf32>
    %129 = arith.subf %125, %128 : vector<8x2xf32>
    %130 = arith.cmpf one, %129, %129 : vector<8x2xf32>
    %131 = vector.broadcast %cst_23 : f32 to vector<8x2xf32>
    %132 = arith.addf %125, %131 : vector<8x2xf32>
    %133 = math.absf %129 : vector<8x2xf32>
    %cst_24 = arith.constant 0.000000e+00 : f32
    %134 = vector.broadcast %cst_24 : f32 to vector<8x2xf32>
    %135 = arith.subf %134, %133 : vector<8x2xf32>
    %136 = math.exp %135 : vector<8x2xf32>
    %137 = math.log1p %136 : vector<8x2xf32>
    %138 = arith.addf %127, %137 : vector<8x2xf32>
    %139 = arith.select %130, %132, %138 : vector<8x2xi1>, vector<8x2xf32>
    %cst_25 = arith.constant 1.000000e-03 : f32
    %140 = vector.broadcast %cst_25 : f32 to vector<8x2xf32>
    %141 = arith.addf %139, %140 : vector<8x2xf32>
    %142 = arith.addf %78, %124 : vector<8x2xf32>
    %143 = arith.mulf %141, %80 : vector<8x2xf32>
    %144 = arith.addf %142, %143 : vector<8x2xf32>
    %c0_26 = arith.constant 0 : index
    %c2 = arith.constant 2 : index
    %145 = vector.load %arg3[%c0_26, %c2] : memref<8x16xf32, #tpu.memory_space<vmem>>, vector<8x2xf32>
    tpu.vector_store %arg3[%c0_26, %c2], %144 {strides = array<i32>} : memref<8x16xf32, #tpu.memory_space<vmem>>, vector<8x2xf32>,
    %146 = vector.extract_strided_slice %10 {offsets = [0, 4], sizes = [8, 2], strides = [1, 1]} : vector<8x16xf32> to vector<8x2xf32>
    %147 = vector.extract_strided_slice %144 {offsets = [0, 0], sizes = [8, 1], strides = [1, 1]} : vector<8x2xf32> to vector<8x1xf32>
    %148 = vector.broadcast %147 : vector<8x1xf32> to vector<8x96xf32>
    %149 = vector.broadcast %1 : vector<1x96xf32> to vector<8x96xf32>
    %150 = arith.mulf %148, %149 : vector<8x96xf32>
    %151 = vector.extract_strided_slice %144 {offsets = [0, 1], sizes = [8, 1], strides = [1, 1]} : vector<8x2xf32> to vector<8x1xf32>
    %152 = vector.broadcast %151 : vector<8x1xf32> to vector<8x96xf32>
    %153 = vector.broadcast %2 : vector<1x96xf32> to vector<8x96xf32>
    %154 = arith.mulf %152, %153 : vector<8x96xf32>
    %155 = arith.addf %150, %154 : vector<8x96xf32>
    %156 = vector.extract_strided_slice %155 {offsets = [0, 0], sizes = [8, 64], strides = [1, 1]} : vector<8x96xf32> to vector<8x64xf32>
    %157 = vector.extract_strided_slice %116 {offsets = [0, 0], sizes = [8, 64], strides = [1, 1]} : vector<8x128xf32> to vector<8x64xf32>
    %158 = arith.addf %156, %157 : vector<8x64xf32>
    %159 = vector.broadcast %3 : vector<1x64xf32> to vector<8x64xf32>
    %160 = arith.addf %158, %159 : vector<8x64xf32>
    %161 = arith.negf %160 : vector<8x64xf32>
    %162 = math.exp %161 : vector<8x64xf32>
    %cst_27 = arith.constant 1.000000e+00 : f32
    %163 = vector.broadcast %cst_27 : f32 to vector<8x64xf32>
    %164 = arith.addf %163, %162 : vector<8x64xf32>
    %165 = arith.divf %163, %164 : vector<8x64xf32>
    %166 = vector.extract_strided_slice %165 {offsets = [0, 0], sizes = [8, 32], strides = [1, 1]} : vector<8x64xf32> to vector<8x32xf32>
    %167 = vector.extract_strided_slice %165 {offsets = [0, 32], sizes = [8, 32], strides = [1, 1]} : vector<8x64xf32> to vector<8x32xf32>
    %168 = vector.extract_strided_slice %155 {offsets = [0, 64], sizes = [8, 32], strides = [1, 1]} : vector<8x96xf32> to vector<8x32xf32>
    %169 = vector.broadcast %4 : vector<1x32xf32> to vector<8x32xf32>
    %170 = arith.addf %168, %169 : vector<8x32xf32>
    %171 = vector.extract_strided_slice %116 {offsets = [0, 64], sizes = [8, 32], strides = [1, 1]} : vector<8x128xf32> to vector<8x32xf32>
    %172 = vector.broadcast %5 : vector<1x32xf32> to vector<8x32xf32>
    %173 = arith.addf %171, %172 : vector<8x32xf32>
    %174 = arith.mulf %166, %173 : vector<8x32xf32>
    %175 = arith.addf %170, %174 : vector<8x32xf32>
    %176 = math.tanh %175 : vector<8x32xf32>
    %cst_28 = arith.constant 1.000000e+00 : f32
    %177 = vector.broadcast %cst_28 : f32 to vector<8x32xf32>
    %178 = arith.subf %177, %167 : vector<8x32xf32>
    %179 = arith.mulf %178, %176 : vector<8x32xf32>
    %180 = arith.mulf %167, %115 : vector<8x32xf32>
    %181 = arith.addf %179, %180 : vector<8x32xf32>
    %cst_29 = arith.constant dense<0.000000e+00> : vector<8x128xf32>
    %182 = tpu.matmul %181, %8, %cst_29 {dimension_numbers = #tpu.dot_dimension_numbers<[1], [0], [0], [1], [0, 0, 1, 1], [], []>} : vector<8x32xf32>, vector<32x128xf32>, vector<8x128xf32> -> vector<8x128xf32>
    %183 = vector.broadcast %6 : vector<1x128xf32> to vector<8x128xf32>
    %184 = arith.addf %182, %183 : vector<8x128xf32>
    %cst_30 = arith.constant 0.000000e+00 : f32
    %185 = vector.broadcast %cst_30 : f32 to vector<8x128xf32>
    %186 = arith.maximumf %184, %185 : vector<8x128xf32>
    %cst_31 = arith.constant dense<0.000000e+00> : vector<8x128xf32>
    %187 = tpu.matmul %186, %9, %cst_31 {dimension_numbers = #tpu.dot_dimension_numbers<[1], [0], [0], [1], [0, 0, 1, 1], [], []>} : vector<8x128xf32>, vector<128x128xf32>, vector<8x128xf32> -> vector<8x128xf32>
    %188 = vector.broadcast %7 : vector<1x128xf32> to vector<8x128xf32>
    %189 = arith.addf %187, %188 : vector<8x128xf32>
    %190 = vector.extract_strided_slice %189 {offsets = [0, 0], sizes = [8, 2], strides = [1, 1]} : vector<8x128xf32> to vector<8x2xf32>
    %191 = vector.extract_strided_slice %189 {offsets = [0, 2], sizes = [8, 2], strides = [1, 1]} : vector<8x128xf32> to vector<8x2xf32>
    %cst_32 = arith.constant 0.000000e+00 : f32
    %192 = vector.broadcast %cst_32 : f32 to vector<8x2xf32>
    %193 = arith.maximumf %191, %192 : vector<8x2xf32>
    %194 = vector.broadcast %cst_32 : f32 to vector<8x2xf32>
    %195 = arith.subf %191, %194 : vector<8x2xf32>
    %196 = arith.cmpf one, %195, %195 : vector<8x2xf32>
    %197 = vector.broadcast %cst_32 : f32 to vector<8x2xf32>
    %198 = arith.addf %191, %197 : vector<8x2xf32>
    %199 = math.absf %195 : vector<8x2xf32>
    %cst_33 = arith.constant 0.000000e+00 : f32
    %200 = vector.broadcast %cst_33 : f32 to vector<8x2xf32>
    %201 = arith.subf %200, %199 : vector<8x2xf32>
    %202 = math.exp %201 : vector<8x2xf32>
    %203 = math.log1p %202 : vector<8x2xf32>
    %204 = arith.addf %193, %203 : vector<8x2xf32>
    %205 = arith.select %196, %198, %204 : vector<8x2xi1>, vector<8x2xf32>
    %cst_34 = arith.constant 1.000000e-03 : f32
    %206 = vector.broadcast %cst_34 : f32 to vector<8x2xf32>
    %207 = arith.addf %205, %206 : vector<8x2xf32>
    %208 = arith.addf %144, %190 : vector<8x2xf32>
    %209 = arith.mulf %207, %146 : vector<8x2xf32>
    %210 = arith.addf %208, %209 : vector<8x2xf32>
    %c0_35 = arith.constant 0 : index
    %c4 = arith.constant 4 : index
    %211 = vector.load %arg3[%c0_35, %c4] : memref<8x16xf32, #tpu.memory_space<vmem>>, vector<8x2xf32>
    tpu.vector_store %arg3[%c0_35, %c4], %210 {strides = array<i32>} : memref<8x16xf32, #tpu.memory_space<vmem>>, vector<8x2xf32>,
    %212 = vector.extract_strided_slice %10 {offsets = [0, 6], sizes = [8, 2], strides = [1, 1]} : vector<8x16xf32> to vector<8x2xf32>
    %213 = vector.extract_strided_slice %210 {offsets = [0, 0], sizes = [8, 1], strides = [1, 1]} : vector<8x2xf32> to vector<8x1xf32>
    %214 = vector.broadcast %213 : vector<8x1xf32> to vector<8x96xf32>
    %215 = vector.broadcast %1 : vector<1x96xf32> to vector<8x96xf32>
    %216 = arith.mulf %214, %215 : vector<8x96xf32>
    %217 = vector.extract_strided_slice %210 {offsets = [0, 1], sizes = [8, 1], strides = [1, 1]} : vector<8x2xf32> to vector<8x1xf32>
    %218 = vector.broadcast %217 : vector<8x1xf32> to vector<8x96xf32>
    %219 = vector.broadcast %2 : vector<1x96xf32> to vector<8x96xf32>
    %220 = arith.mulf %218, %219 : vector<8x96xf32>
    %221 = arith.addf %216, %220 : vector<8x96xf32>
    %222 = vector.extract_strided_slice %221 {offsets = [0, 0], sizes = [8, 64], strides = [1, 1]} : vector<8x96xf32> to vector<8x64xf32>
    %223 = vector.extract_strided_slice %182 {offsets = [0, 0], sizes = [8, 64], strides = [1, 1]} : vector<8x128xf32> to vector<8x64xf32>
    %224 = arith.addf %222, %223 : vector<8x64xf32>
    %225 = vector.broadcast %3 : vector<1x64xf32> to vector<8x64xf32>
    %226 = arith.addf %224, %225 : vector<8x64xf32>
    %227 = arith.negf %226 : vector<8x64xf32>
    %228 = math.exp %227 : vector<8x64xf32>
    %cst_36 = arith.constant 1.000000e+00 : f32
    %229 = vector.broadcast %cst_36 : f32 to vector<8x64xf32>
    %230 = arith.addf %229, %228 : vector<8x64xf32>
    %231 = arith.divf %229, %230 : vector<8x64xf32>
    %232 = vector.extract_strided_slice %231 {offsets = [0, 0], sizes = [8, 32], strides = [1, 1]} : vector<8x64xf32> to vector<8x32xf32>
    %233 = vector.extract_strided_slice %231 {offsets = [0, 32], sizes = [8, 32], strides = [1, 1]} : vector<8x64xf32> to vector<8x32xf32>
    %234 = vector.extract_strided_slice %221 {offsets = [0, 64], sizes = [8, 32], strides = [1, 1]} : vector<8x96xf32> to vector<8x32xf32>
    %235 = vector.broadcast %4 : vector<1x32xf32> to vector<8x32xf32>
    %236 = arith.addf %234, %235 : vector<8x32xf32>
    %237 = vector.extract_strided_slice %182 {offsets = [0, 64], sizes = [8, 32], strides = [1, 1]} : vector<8x128xf32> to vector<8x32xf32>
    %238 = vector.broadcast %5 : vector<1x32xf32> to vector<8x32xf32>
    %239 = arith.addf %237, %238 : vector<8x32xf32>
    %240 = arith.mulf %232, %239 : vector<8x32xf32>
    %241 = arith.addf %236, %240 : vector<8x32xf32>
    %242 = math.tanh %241 : vector<8x32xf32>
    %cst_37 = arith.constant 1.000000e+00 : f32
    %243 = vector.broadcast %cst_37 : f32 to vector<8x32xf32>
    %244 = arith.subf %243, %233 : vector<8x32xf32>
    %245 = arith.mulf %244, %242 : vector<8x32xf32>
    %246 = arith.mulf %233, %181 : vector<8x32xf32>
    %247 = arith.addf %245, %246 : vector<8x32xf32>
    %cst_38 = arith.constant dense<0.000000e+00> : vector<8x128xf32>
    %248 = tpu.matmul %247, %8, %cst_38 {dimension_numbers = #tpu.dot_dimension_numbers<[1], [0], [0], [1], [0, 0, 1, 1], [], []>} : vector<8x32xf32>, vector<32x128xf32>, vector<8x128xf32> -> vector<8x128xf32>
    %249 = vector.broadcast %6 : vector<1x128xf32> to vector<8x128xf32>
    %250 = arith.addf %248, %249 : vector<8x128xf32>
    %cst_39 = arith.constant 0.000000e+00 : f32
    %251 = vector.broadcast %cst_39 : f32 to vector<8x128xf32>
    %252 = arith.maximumf %250, %251 : vector<8x128xf32>
    %cst_40 = arith.constant dense<0.000000e+00> : vector<8x128xf32>
    %253 = tpu.matmul %252, %9, %cst_40 {dimension_numbers = #tpu.dot_dimension_numbers<[1], [0], [0], [1], [0, 0, 1, 1], [], []>} : vector<8x128xf32>, vector<128x128xf32>, vector<8x128xf32> -> vector<8x128xf32>
    %254 = vector.broadcast %7 : vector<1x128xf32> to vector<8x128xf32>
    %255 = arith.addf %253, %254 : vector<8x128xf32>
    %256 = vector.extract_strided_slice %255 {offsets = [0, 0], sizes = [8, 2], strides = [1, 1]} : vector<8x128xf32> to vector<8x2xf32>
    %257 = vector.extract_strided_slice %255 {offsets = [0, 2], sizes = [8, 2], strides = [1, 1]} : vector<8x128xf32> to vector<8x2xf32>
    %cst_41 = arith.constant 0.000000e+00 : f32
    %258 = vector.broadcast %cst_41 : f32 to vector<8x2xf32>
    %259 = arith.maximumf %257, %258 : vector<8x2xf32>
    %260 = vector.broadcast %cst_41 : f32 to vector<8x2xf32>
    %261 = arith.subf %257, %260 : vector<8x2xf32>
    %262 = arith.cmpf one, %261, %261 : vector<8x2xf32>
    %263 = vector.broadcast %cst_41 : f32 to vector<8x2xf32>
    %264 = arith.addf %257, %263 : vector<8x2xf32>
    %265 = math.absf %261 : vector<8x2xf32>
    %cst_42 = arith.constant 0.000000e+00 : f32
    %266 = vector.broadcast %cst_42 : f32 to vector<8x2xf32>
    %267 = arith.subf %266, %265 : vector<8x2xf32>
    %268 = math.exp %267 : vector<8x2xf32>
    %269 = math.log1p %268 : vector<8x2xf32>
    %270 = arith.addf %259, %269 : vector<8x2xf32>
    %271 = arith.select %262, %264, %270 : vector<8x2xi1>, vector<8x2xf32>
    %cst_43 = arith.constant 1.000000e-03 : f32
    %272 = vector.broadcast %cst_43 : f32 to vector<8x2xf32>
    %273 = arith.addf %271, %272 : vector<8x2xf32>
    %274 = arith.addf %210, %256 : vector<8x2xf32>
    %275 = arith.mulf %273, %212 : vector<8x2xf32>
    %276 = arith.addf %274, %275 : vector<8x2xf32>
    %c0_44 = arith.constant 0 : index
    %c6 = arith.constant 6 : index
    %277 = vector.load %arg3[%c0_44, %c6] : memref<8x16xf32, #tpu.memory_space<vmem>>, vector<8x2xf32>
    tpu.vector_store %arg3[%c0_44, %c6], %276 {strides = array<i32>} : memref<8x16xf32, #tpu.memory_space<vmem>>, vector<8x2xf32>,
    %278 = vector.extract_strided_slice %10 {offsets = [0, 8], sizes = [8, 2], strides = [1, 1]} : vector<8x16xf32> to vector<8x2xf32>
    %279 = vector.extract_strided_slice %276 {offsets = [0, 0], sizes = [8, 1], strides = [1, 1]} : vector<8x2xf32> to vector<8x1xf32>
    %280 = vector.broadcast %279 : vector<8x1xf32> to vector<8x96xf32>
    %281 = vector.broadcast %1 : vector<1x96xf32> to vector<8x96xf32>
    %282 = arith.mulf %280, %281 : vector<8x96xf32>
    %283 = vector.extract_strided_slice %276 {offsets = [0, 1], sizes = [8, 1], strides = [1, 1]} : vector<8x2xf32> to vector<8x1xf32>
    %284 = vector.broadcast %283 : vector<8x1xf32> to vector<8x96xf32>
    %285 = vector.broadcast %2 : vector<1x96xf32> to vector<8x96xf32>
    %286 = arith.mulf %284, %285 : vector<8x96xf32>
    %287 = arith.addf %282, %286 : vector<8x96xf32>
    %288 = vector.extract_strided_slice %287 {offsets = [0, 0], sizes = [8, 64], strides = [1, 1]} : vector<8x96xf32> to vector<8x64xf32>
    %289 = vector.extract_strided_slice %248 {offsets = [0, 0], sizes = [8, 64], strides = [1, 1]} : vector<8x128xf32> to vector<8x64xf32>
    %290 = arith.addf %288, %289 : vector<8x64xf32>
    %291 = vector.broadcast %3 : vector<1x64xf32> to vector<8x64xf32>
    %292 = arith.addf %290, %291 : vector<8x64xf32>
    %293 = arith.negf %292 : vector<8x64xf32>
    %294 = math.exp %293 : vector<8x64xf32>
    %cst_45 = arith.constant 1.000000e+00 : f32
    %295 = vector.broadcast %cst_45 : f32 to vector<8x64xf32>
    %296 = arith.addf %295, %294 : vector<8x64xf32>
    %297 = arith.divf %295, %296 : vector<8x64xf32>
    %298 = vector.extract_strided_slice %297 {offsets = [0, 0], sizes = [8, 32], strides = [1, 1]} : vector<8x64xf32> to vector<8x32xf32>
    %299 = vector.extract_strided_slice %297 {offsets = [0, 32], sizes = [8, 32], strides = [1, 1]} : vector<8x64xf32> to vector<8x32xf32>
    %300 = vector.extract_strided_slice %287 {offsets = [0, 64], sizes = [8, 32], strides = [1, 1]} : vector<8x96xf32> to vector<8x32xf32>
    %301 = vector.broadcast %4 : vector<1x32xf32> to vector<8x32xf32>
    %302 = arith.addf %300, %301 : vector<8x32xf32>
    %303 = vector.extract_strided_slice %248 {offsets = [0, 64], sizes = [8, 32], strides = [1, 1]} : vector<8x128xf32> to vector<8x32xf32>
    %304 = vector.broadcast %5 : vector<1x32xf32> to vector<8x32xf32>
    %305 = arith.addf %303, %304 : vector<8x32xf32>
    %306 = arith.mulf %298, %305 : vector<8x32xf32>
    %307 = arith.addf %302, %306 : vector<8x32xf32>
    %308 = math.tanh %307 : vector<8x32xf32>
    %cst_46 = arith.constant 1.000000e+00 : f32
    %309 = vector.broadcast %cst_46 : f32 to vector<8x32xf32>
    %310 = arith.subf %309, %299 : vector<8x32xf32>
    %311 = arith.mulf %310, %308 : vector<8x32xf32>
    %312 = arith.mulf %299, %247 : vector<8x32xf32>
    %313 = arith.addf %311, %312 : vector<8x32xf32>
    %cst_47 = arith.constant dense<0.000000e+00> : vector<8x128xf32>
    %314 = tpu.matmul %313, %8, %cst_47 {dimension_numbers = #tpu.dot_dimension_numbers<[1], [0], [0], [1], [0, 0, 1, 1], [], []>} : vector<8x32xf32>, vector<32x128xf32>, vector<8x128xf32> -> vector<8x128xf32>
    %315 = vector.broadcast %6 : vector<1x128xf32> to vector<8x128xf32>
    %316 = arith.addf %314, %315 : vector<8x128xf32>
    %cst_48 = arith.constant 0.000000e+00 : f32
    %317 = vector.broadcast %cst_48 : f32 to vector<8x128xf32>
    %318 = arith.maximumf %316, %317 : vector<8x128xf32>
    %cst_49 = arith.constant dense<0.000000e+00> : vector<8x128xf32>
    %319 = tpu.matmul %318, %9, %cst_49 {dimension_numbers = #tpu.dot_dimension_numbers<[1], [0], [0], [1], [0, 0, 1, 1], [], []>} : vector<8x128xf32>, vector<128x128xf32>, vector<8x128xf32> -> vector<8x128xf32>
    %320 = vector.broadcast %7 : vector<1x128xf32> to vector<8x128xf32>
    %321 = arith.addf %319, %320 : vector<8x128xf32>
    %322 = vector.extract_strided_slice %321 {offsets = [0, 0], sizes = [8, 2], strides = [1, 1]} : vector<8x128xf32> to vector<8x2xf32>
    %323 = vector.extract_strided_slice %321 {offsets = [0, 2], sizes = [8, 2], strides = [1, 1]} : vector<8x128xf32> to vector<8x2xf32>
    %cst_50 = arith.constant 0.000000e+00 : f32
    %324 = vector.broadcast %cst_50 : f32 to vector<8x2xf32>
    %325 = arith.maximumf %323, %324 : vector<8x2xf32>
    %326 = vector.broadcast %cst_50 : f32 to vector<8x2xf32>
    %327 = arith.subf %323, %326 : vector<8x2xf32>
    %328 = arith.cmpf one, %327, %327 : vector<8x2xf32>
    %329 = vector.broadcast %cst_50 : f32 to vector<8x2xf32>
    %330 = arith.addf %323, %329 : vector<8x2xf32>
    %331 = math.absf %327 : vector<8x2xf32>
    %cst_51 = arith.constant 0.000000e+00 : f32
    %332 = vector.broadcast %cst_51 : f32 to vector<8x2xf32>
    %333 = arith.subf %332, %331 : vector<8x2xf32>
    %334 = math.exp %333 : vector<8x2xf32>
    %335 = math.log1p %334 : vector<8x2xf32>
    %336 = arith.addf %325, %335 : vector<8x2xf32>
    %337 = arith.select %328, %330, %336 : vector<8x2xi1>, vector<8x2xf32>
    %cst_52 = arith.constant 1.000000e-03 : f32
    %338 = vector.broadcast %cst_52 : f32 to vector<8x2xf32>
    %339 = arith.addf %337, %338 : vector<8x2xf32>
    %340 = arith.addf %276, %322 : vector<8x2xf32>
    %341 = arith.mulf %339, %278 : vector<8x2xf32>
    %342 = arith.addf %340, %341 : vector<8x2xf32>
    %c0_53 = arith.constant 0 : index
    %c8_54 = arith.constant 8 : index
    %343 = vector.load %arg3[%c0_53, %c8_54] : memref<8x16xf32, #tpu.memory_space<vmem>>, vector<8x2xf32>
    tpu.vector_store %arg3[%c0_53, %c8_54], %342 {strides = array<i32>} : memref<8x16xf32, #tpu.memory_space<vmem>>, vector<8x2xf32>,
    %344 = vector.extract_strided_slice %10 {offsets = [0, 10], sizes = [8, 2], strides = [1, 1]} : vector<8x16xf32> to vector<8x2xf32>
    %345 = vector.extract_strided_slice %342 {offsets = [0, 0], sizes = [8, 1], strides = [1, 1]} : vector<8x2xf32> to vector<8x1xf32>
    %346 = vector.broadcast %345 : vector<8x1xf32> to vector<8x96xf32>
    %347 = vector.broadcast %1 : vector<1x96xf32> to vector<8x96xf32>
    %348 = arith.mulf %346, %347 : vector<8x96xf32>
    %349 = vector.extract_strided_slice %342 {offsets = [0, 1], sizes = [8, 1], strides = [1, 1]} : vector<8x2xf32> to vector<8x1xf32>
    %350 = vector.broadcast %349 : vector<8x1xf32> to vector<8x96xf32>
    %351 = vector.broadcast %2 : vector<1x96xf32> to vector<8x96xf32>
    %352 = arith.mulf %350, %351 : vector<8x96xf32>
    %353 = arith.addf %348, %352 : vector<8x96xf32>
    %354 = vector.extract_strided_slice %353 {offsets = [0, 0], sizes = [8, 64], strides = [1, 1]} : vector<8x96xf32> to vector<8x64xf32>
    %355 = vector.extract_strided_slice %314 {offsets = [0, 0], sizes = [8, 64], strides = [1, 1]} : vector<8x128xf32> to vector<8x64xf32>
    %356 = arith.addf %354, %355 : vector<8x64xf32>
    %357 = vector.broadcast %3 : vector<1x64xf32> to vector<8x64xf32>
    %358 = arith.addf %356, %357 : vector<8x64xf32>
    %359 = arith.negf %358 : vector<8x64xf32>
    %360 = math.exp %359 : vector<8x64xf32>
    %cst_55 = arith.constant 1.000000e+00 : f32
    %361 = vector.broadcast %cst_55 : f32 to vector<8x64xf32>
    %362 = arith.addf %361, %360 : vector<8x64xf32>
    %363 = arith.divf %361, %362 : vector<8x64xf32>
    %364 = vector.extract_strided_slice %363 {offsets = [0, 0], sizes = [8, 32], strides = [1, 1]} : vector<8x64xf32> to vector<8x32xf32>
    %365 = vector.extract_strided_slice %363 {offsets = [0, 32], sizes = [8, 32], strides = [1, 1]} : vector<8x64xf32> to vector<8x32xf32>
    %366 = vector.extract_strided_slice %353 {offsets = [0, 64], sizes = [8, 32], strides = [1, 1]} : vector<8x96xf32> to vector<8x32xf32>
    %367 = vector.broadcast %4 : vector<1x32xf32> to vector<8x32xf32>
    %368 = arith.addf %366, %367 : vector<8x32xf32>
    %369 = vector.extract_strided_slice %314 {offsets = [0, 64], sizes = [8, 32], strides = [1, 1]} : vector<8x128xf32> to vector<8x32xf32>
    %370 = vector.broadcast %5 : vector<1x32xf32> to vector<8x32xf32>
    %371 = arith.addf %369, %370 : vector<8x32xf32>
    %372 = arith.mulf %364, %371 : vector<8x32xf32>
    %373 = arith.addf %368, %372 : vector<8x32xf32>
    %374 = math.tanh %373 : vector<8x32xf32>
    %cst_56 = arith.constant 1.000000e+00 : f32
    %375 = vector.broadcast %cst_56 : f32 to vector<8x32xf32>
    %376 = arith.subf %375, %365 : vector<8x32xf32>
    %377 = arith.mulf %376, %374 : vector<8x32xf32>
    %378 = arith.mulf %365, %313 : vector<8x32xf32>
    %379 = arith.addf %377, %378 : vector<8x32xf32>
    %cst_57 = arith.constant dense<0.000000e+00> : vector<8x128xf32>
    %380 = tpu.matmul %379, %8, %cst_57 {dimension_numbers = #tpu.dot_dimension_numbers<[1], [0], [0], [1], [0, 0, 1, 1], [], []>} : vector<8x32xf32>, vector<32x128xf32>, vector<8x128xf32> -> vector<8x128xf32>
    %381 = vector.broadcast %6 : vector<1x128xf32> to vector<8x128xf32>
    %382 = arith.addf %380, %381 : vector<8x128xf32>
    %cst_58 = arith.constant 0.000000e+00 : f32
    %383 = vector.broadcast %cst_58 : f32 to vector<8x128xf32>
    %384 = arith.maximumf %382, %383 : vector<8x128xf32>
    %cst_59 = arith.constant dense<0.000000e+00> : vector<8x128xf32>
    %385 = tpu.matmul %384, %9, %cst_59 {dimension_numbers = #tpu.dot_dimension_numbers<[1], [0], [0], [1], [0, 0, 1, 1], [], []>} : vector<8x128xf32>, vector<128x128xf32>, vector<8x128xf32> -> vector<8x128xf32>
    %386 = vector.broadcast %7 : vector<1x128xf32> to vector<8x128xf32>
    %387 = arith.addf %385, %386 : vector<8x128xf32>
    %388 = vector.extract_strided_slice %387 {offsets = [0, 0], sizes = [8, 2], strides = [1, 1]} : vector<8x128xf32> to vector<8x2xf32>
    %389 = vector.extract_strided_slice %387 {offsets = [0, 2], sizes = [8, 2], strides = [1, 1]} : vector<8x128xf32> to vector<8x2xf32>
    %cst_60 = arith.constant 0.000000e+00 : f32
    %390 = vector.broadcast %cst_60 : f32 to vector<8x2xf32>
    %391 = arith.maximumf %389, %390 : vector<8x2xf32>
    %392 = vector.broadcast %cst_60 : f32 to vector<8x2xf32>
    %393 = arith.subf %389, %392 : vector<8x2xf32>
    %394 = arith.cmpf one, %393, %393 : vector<8x2xf32>
    %395 = vector.broadcast %cst_60 : f32 to vector<8x2xf32>
    %396 = arith.addf %389, %395 : vector<8x2xf32>
    %397 = math.absf %393 : vector<8x2xf32>
    %cst_61 = arith.constant 0.000000e+00 : f32
    %398 = vector.broadcast %cst_61 : f32 to vector<8x2xf32>
    %399 = arith.subf %398, %397 : vector<8x2xf32>
    %400 = math.exp %399 : vector<8x2xf32>
    %401 = math.log1p %400 : vector<8x2xf32>
    %402 = arith.addf %391, %401 : vector<8x2xf32>
    %403 = arith.select %394, %396, %402 : vector<8x2xi1>, vector<8x2xf32>
    %cst_62 = arith.constant 1.000000e-03 : f32
    %404 = vector.broadcast %cst_62 : f32 to vector<8x2xf32>
    %405 = arith.addf %403, %404 : vector<8x2xf32>
    %406 = arith.addf %342, %388 : vector<8x2xf32>
    %407 = arith.mulf %405, %344 : vector<8x2xf32>
    %408 = arith.addf %406, %407 : vector<8x2xf32>
    %c0_63 = arith.constant 0 : index
    %c10 = arith.constant 10 : index
    %409 = vector.load %arg3[%c0_63, %c10] : memref<8x16xf32, #tpu.memory_space<vmem>>, vector<8x2xf32>
    tpu.vector_store %arg3[%c0_63, %c10], %408 {strides = array<i32>} : memref<8x16xf32, #tpu.memory_space<vmem>>, vector<8x2xf32>,
    %410 = vector.extract_strided_slice %10 {offsets = [0, 12], sizes = [8, 2], strides = [1, 1]} : vector<8x16xf32> to vector<8x2xf32>
    %411 = vector.extract_strided_slice %408 {offsets = [0, 0], sizes = [8, 1], strides = [1, 1]} : vector<8x2xf32> to vector<8x1xf32>
    %412 = vector.broadcast %411 : vector<8x1xf32> to vector<8x96xf32>
    %413 = vector.broadcast %1 : vector<1x96xf32> to vector<8x96xf32>
    %414 = arith.mulf %412, %413 : vector<8x96xf32>
    %415 = vector.extract_strided_slice %408 {offsets = [0, 1], sizes = [8, 1], strides = [1, 1]} : vector<8x2xf32> to vector<8x1xf32>
    %416 = vector.broadcast %415 : vector<8x1xf32> to vector<8x96xf32>
    %417 = vector.broadcast %2 : vector<1x96xf32> to vector<8x96xf32>
    %418 = arith.mulf %416, %417 : vector<8x96xf32>
    %419 = arith.addf %414, %418 : vector<8x96xf32>
    %420 = vector.extract_strided_slice %419 {offsets = [0, 0], sizes = [8, 64], strides = [1, 1]} : vector<8x96xf32> to vector<8x64xf32>
    %421 = vector.extract_strided_slice %380 {offsets = [0, 0], sizes = [8, 64], strides = [1, 1]} : vector<8x128xf32> to vector<8x64xf32>
    %422 = arith.addf %420, %421 : vector<8x64xf32>
    %423 = vector.broadcast %3 : vector<1x64xf32> to vector<8x64xf32>
    %424 = arith.addf %422, %423 : vector<8x64xf32>
    %425 = arith.negf %424 : vector<8x64xf32>
    %426 = math.exp %425 : vector<8x64xf32>
    %cst_64 = arith.constant 1.000000e+00 : f32
    %427 = vector.broadcast %cst_64 : f32 to vector<8x64xf32>
    %428 = arith.addf %427, %426 : vector<8x64xf32>
    %429 = arith.divf %427, %428 : vector<8x64xf32>
    %430 = vector.extract_strided_slice %429 {offsets = [0, 0], sizes = [8, 32], strides = [1, 1]} : vector<8x64xf32> to vector<8x32xf32>
    %431 = vector.extract_strided_slice %429 {offsets = [0, 32], sizes = [8, 32], strides = [1, 1]} : vector<8x64xf32> to vector<8x32xf32>
    %432 = vector.extract_strided_slice %419 {offsets = [0, 64], sizes = [8, 32], strides = [1, 1]} : vector<8x96xf32> to vector<8x32xf32>
    %433 = vector.broadcast %4 : vector<1x32xf32> to vector<8x32xf32>
    %434 = arith.addf %432, %433 : vector<8x32xf32>
    %435 = vector.extract_strided_slice %380 {offsets = [0, 64], sizes = [8, 32], strides = [1, 1]} : vector<8x128xf32> to vector<8x32xf32>
    %436 = vector.broadcast %5 : vector<1x32xf32> to vector<8x32xf32>
    %437 = arith.addf %435, %436 : vector<8x32xf32>
    %438 = arith.mulf %430, %437 : vector<8x32xf32>
    %439 = arith.addf %434, %438 : vector<8x32xf32>
    %440 = math.tanh %439 : vector<8x32xf32>
    %cst_65 = arith.constant 1.000000e+00 : f32
    %441 = vector.broadcast %cst_65 : f32 to vector<8x32xf32>
    %442 = arith.subf %441, %431 : vector<8x32xf32>
    %443 = arith.mulf %442, %440 : vector<8x32xf32>
    %444 = arith.mulf %431, %379 : vector<8x32xf32>
    %445 = arith.addf %443, %444 : vector<8x32xf32>
    %cst_66 = arith.constant dense<0.000000e+00> : vector<8x128xf32>
    %446 = tpu.matmul %445, %8, %cst_66 {dimension_numbers = #tpu.dot_dimension_numbers<[1], [0], [0], [1], [0, 0, 1, 1], [], []>} : vector<8x32xf32>, vector<32x128xf32>, vector<8x128xf32> -> vector<8x128xf32>
    %447 = vector.broadcast %6 : vector<1x128xf32> to vector<8x128xf32>
    %448 = arith.addf %446, %447 : vector<8x128xf32>
    %cst_67 = arith.constant 0.000000e+00 : f32
    %449 = vector.broadcast %cst_67 : f32 to vector<8x128xf32>
    %450 = arith.maximumf %448, %449 : vector<8x128xf32>
    %cst_68 = arith.constant dense<0.000000e+00> : vector<8x128xf32>
    %451 = tpu.matmul %450, %9, %cst_68 {dimension_numbers = #tpu.dot_dimension_numbers<[1], [0], [0], [1], [0, 0, 1, 1], [], []>} : vector<8x128xf32>, vector<128x128xf32>, vector<8x128xf32> -> vector<8x128xf32>
    %452 = vector.broadcast %7 : vector<1x128xf32> to vector<8x128xf32>
    %453 = arith.addf %451, %452 : vector<8x128xf32>
    %454 = vector.extract_strided_slice %453 {offsets = [0, 0], sizes = [8, 2], strides = [1, 1]} : vector<8x128xf32> to vector<8x2xf32>
    %455 = vector.extract_strided_slice %453 {offsets = [0, 2], sizes = [8, 2], strides = [1, 1]} : vector<8x128xf32> to vector<8x2xf32>
    %cst_69 = arith.constant 0.000000e+00 : f32
    %456 = vector.broadcast %cst_69 : f32 to vector<8x2xf32>
    %457 = arith.maximumf %455, %456 : vector<8x2xf32>
    %458 = vector.broadcast %cst_69 : f32 to vector<8x2xf32>
    %459 = arith.subf %455, %458 : vector<8x2xf32>
    %460 = arith.cmpf one, %459, %459 : vector<8x2xf32>
    %461 = vector.broadcast %cst_69 : f32 to vector<8x2xf32>
    %462 = arith.addf %455, %461 : vector<8x2xf32>
    %463 = math.absf %459 : vector<8x2xf32>
    %cst_70 = arith.constant 0.000000e+00 : f32
    %464 = vector.broadcast %cst_70 : f32 to vector<8x2xf32>
    %465 = arith.subf %464, %463 : vector<8x2xf32>
    %466 = math.exp %465 : vector<8x2xf32>
    %467 = math.log1p %466 : vector<8x2xf32>
    %468 = arith.addf %457, %467 : vector<8x2xf32>
    %469 = arith.select %460, %462, %468 : vector<8x2xi1>, vector<8x2xf32>
    %cst_71 = arith.constant 1.000000e-03 : f32
    %470 = vector.broadcast %cst_71 : f32 to vector<8x2xf32>
    %471 = arith.addf %469, %470 : vector<8x2xf32>
    %472 = arith.addf %408, %454 : vector<8x2xf32>
    %473 = arith.mulf %471, %410 : vector<8x2xf32>
    %474 = arith.addf %472, %473 : vector<8x2xf32>
    %c0_72 = arith.constant 0 : index
    %c12 = arith.constant 12 : index
    %475 = vector.load %arg3[%c0_72, %c12] : memref<8x16xf32, #tpu.memory_space<vmem>>, vector<8x2xf32>
    tpu.vector_store %arg3[%c0_72, %c12], %474 {strides = array<i32>} : memref<8x16xf32, #tpu.memory_space<vmem>>, vector<8x2xf32>,
    %476 = vector.extract_strided_slice %10 {offsets = [0, 14], sizes = [8, 2], strides = [1, 1]} : vector<8x16xf32> to vector<8x2xf32>
    %477 = vector.extract_strided_slice %474 {offsets = [0, 0], sizes = [8, 1], strides = [1, 1]} : vector<8x2xf32> to vector<8x1xf32>
    %478 = vector.broadcast %477 : vector<8x1xf32> to vector<8x96xf32>
    %479 = vector.broadcast %1 : vector<1x96xf32> to vector<8x96xf32>
    %480 = arith.mulf %478, %479 : vector<8x96xf32>
    %481 = vector.extract_strided_slice %474 {offsets = [0, 1], sizes = [8, 1], strides = [1, 1]} : vector<8x2xf32> to vector<8x1xf32>
    %482 = vector.broadcast %481 : vector<8x1xf32> to vector<8x96xf32>
    %483 = vector.broadcast %2 : vector<1x96xf32> to vector<8x96xf32>
    %484 = arith.mulf %482, %483 : vector<8x96xf32>
    %485 = arith.addf %480, %484 : vector<8x96xf32>
    %486 = vector.extract_strided_slice %485 {offsets = [0, 0], sizes = [8, 64], strides = [1, 1]} : vector<8x96xf32> to vector<8x64xf32>
    %487 = vector.extract_strided_slice %446 {offsets = [0, 0], sizes = [8, 64], strides = [1, 1]} : vector<8x128xf32> to vector<8x64xf32>
    %488 = arith.addf %486, %487 : vector<8x64xf32>
    %489 = vector.broadcast %3 : vector<1x64xf32> to vector<8x64xf32>
    %490 = arith.addf %488, %489 : vector<8x64xf32>
    %491 = arith.negf %490 : vector<8x64xf32>
    %492 = math.exp %491 : vector<8x64xf32>
    %cst_73 = arith.constant 1.000000e+00 : f32
    %493 = vector.broadcast %cst_73 : f32 to vector<8x64xf32>
    %494 = arith.addf %493, %492 : vector<8x64xf32>
    %495 = arith.divf %493, %494 : vector<8x64xf32>
    %496 = vector.extract_strided_slice %495 {offsets = [0, 0], sizes = [8, 32], strides = [1, 1]} : vector<8x64xf32> to vector<8x32xf32>
    %497 = vector.extract_strided_slice %495 {offsets = [0, 32], sizes = [8, 32], strides = [1, 1]} : vector<8x64xf32> to vector<8x32xf32>
    %498 = vector.extract_strided_slice %485 {offsets = [0, 64], sizes = [8, 32], strides = [1, 1]} : vector<8x96xf32> to vector<8x32xf32>
    %499 = vector.broadcast %4 : vector<1x32xf32> to vector<8x32xf32>
    %500 = arith.addf %498, %499 : vector<8x32xf32>
    %501 = vector.extract_strided_slice %446 {offsets = [0, 64], sizes = [8, 32], strides = [1, 1]} : vector<8x128xf32> to vector<8x32xf32>
    %502 = vector.broadcast %5 : vector<1x32xf32> to vector<8x32xf32>
    %503 = arith.addf %501, %502 : vector<8x32xf32>
    %504 = arith.mulf %496, %503 : vector<8x32xf32>
    %505 = arith.addf %500, %504 : vector<8x32xf32>
    %506 = math.tanh %505 : vector<8x32xf32>
    %cst_74 = arith.constant 1.000000e+00 : f32
    %507 = vector.broadcast %cst_74 : f32 to vector<8x32xf32>
    %508 = arith.subf %507, %497 : vector<8x32xf32>
    %509 = arith.mulf %508, %506 : vector<8x32xf32>
    %510 = arith.mulf %497, %445 : vector<8x32xf32>
    %511 = arith.addf %509, %510 : vector<8x32xf32>
    %cst_75 = arith.constant dense<0.000000e+00> : vector<8x128xf32>
    %512 = tpu.matmul %511, %8, %cst_75 {dimension_numbers = #tpu.dot_dimension_numbers<[1], [0], [0], [1], [0, 0, 1, 1], [], []>} : vector<8x32xf32>, vector<32x128xf32>, vector<8x128xf32> -> vector<8x128xf32>
    %513 = vector.broadcast %6 : vector<1x128xf32> to vector<8x128xf32>
    %514 = arith.addf %512, %513 : vector<8x128xf32>
    %cst_76 = arith.constant 0.000000e+00 : f32
    %515 = vector.broadcast %cst_76 : f32 to vector<8x128xf32>
    %516 = arith.maximumf %514, %515 : vector<8x128xf32>
    %cst_77 = arith.constant dense<0.000000e+00> : vector<8x128xf32>
    %517 = tpu.matmul %516, %9, %cst_77 {dimension_numbers = #tpu.dot_dimension_numbers<[1], [0], [0], [1], [0, 0, 1, 1], [], []>} : vector<8x128xf32>, vector<128x128xf32>, vector<8x128xf32> -> vector<8x128xf32>
    %518 = vector.broadcast %7 : vector<1x128xf32> to vector<8x128xf32>
    %519 = arith.addf %517, %518 : vector<8x128xf32>
    %520 = vector.extract_strided_slice %519 {offsets = [0, 0], sizes = [8, 2], strides = [1, 1]} : vector<8x128xf32> to vector<8x2xf32>
    %521 = vector.extract_strided_slice %519 {offsets = [0, 2], sizes = [8, 2], strides = [1, 1]} : vector<8x128xf32> to vector<8x2xf32>
    %cst_78 = arith.constant 0.000000e+00 : f32
    %522 = vector.broadcast %cst_78 : f32 to vector<8x2xf32>
    %523 = arith.maximumf %521, %522 : vector<8x2xf32>
    %524 = vector.broadcast %cst_78 : f32 to vector<8x2xf32>
    %525 = arith.subf %521, %524 : vector<8x2xf32>
    %526 = arith.cmpf one, %525, %525 : vector<8x2xf32>
    %527 = vector.broadcast %cst_78 : f32 to vector<8x2xf32>
    %528 = arith.addf %521, %527 : vector<8x2xf32>
    %529 = math.absf %525 : vector<8x2xf32>
    %cst_79 = arith.constant 0.000000e+00 : f32
    %530 = vector.broadcast %cst_79 : f32 to vector<8x2xf32>
    %531 = arith.subf %530, %529 : vector<8x2xf32>
    %532 = math.exp %531 : vector<8x2xf32>
    %533 = math.log1p %532 : vector<8x2xf32>
    %534 = arith.addf %523, %533 : vector<8x2xf32>
    %535 = arith.select %526, %528, %534 : vector<8x2xi1>, vector<8x2xf32>
    %cst_80 = arith.constant 1.000000e-03 : f32
    %536 = vector.broadcast %cst_80 : f32 to vector<8x2xf32>
    %537 = arith.addf %535, %536 : vector<8x2xf32>
    %538 = arith.addf %474, %520 : vector<8x2xf32>
    %539 = arith.mulf %537, %476 : vector<8x2xf32>
    %540 = arith.addf %538, %539 : vector<8x2xf32>
    %c0_81 = arith.constant 0 : index
    %c14 = arith.constant 14 : index
    %541 = vector.load %arg3[%c0_81, %c14] : memref<8x16xf32, #tpu.memory_space<vmem>>, vector<8x2xf32>
    tpu.vector_store %arg3[%c0_81, %c14], %540 {strides = array<i32>} : memref<8x16xf32, #tpu.memory_space<vmem>>, vector<8x2xf32>,
    return
  }
}

</mosaic_0001>

<bundles_post_ra>
// kernel: autoregressive_flow_forward.1
= control target key start
LH: loop header
LB: loop body
LE: loop exit
PB: predicated region body
PF: predicated region fallthrough
CT: control target
= control target key end

     0   :  { %v111_v0 = vlaneseq  ;;  %v2604_v1 = vmov 0.0   ;;  %vm2605_vm0 = vmmov 0   ;;  %vm37_vm1 = vcmask 261120   ;;  %s2606_s24 = smov 96   ;;  %s2608_s25 = smov 32   ;;  %s3465_s2 = inlined_call_operand.vmem [shape: f32[168,128], index: 2, kind: input, shape index: {}]   ;;  %s3466_s1 = inlined_call_operand.vmem [shape: f32[8,32], index: 1, kind: input, shape index: {}]   ;;  %s3467_s0 = inlined_call_operand.vmem [shape: f32[8,16], index: 0, kind: input, shape index: {}]   ;;  %s3468_s3 = inlined_call_operand.vmem [shape: f32[8,16], index: 3, kind: output, shape index: {}]  }
   0x1   :  { %2101 = vmatprep.subr.mxu0 %v2604_v1  ;;  %v2648_v2 = vld [vmem:[%s3465_s2 + $0x20] sm:$0xff]  ;;  %v2653_v3 = vld [vmem:[%s3465_s2 + $0x18] sm:$0xff]  ;;  %2109 = vmatprep.mubr.msk.f32.mxu0 %vm2605_vm0, %v2604_v1  ;;  %v2665_v5 = vld [vmem:[%s3465_s2 + $0x10] sm:$0xff]  ;;  %s2609_s7 = smov 2   ;;  %s2612_s8 = smov 126   ;;  %vm346_vm4 = vcmask 15360  }
   0x2   :  { %2102 = vmatpush3.msra.mxu0 %v2648_v2  ;;  %v2658_v4 = vshrl.u32 %v111_v0, 7  ;;  %2112 = vmatprep.subr.mxu1 %v2604_v1  ;;  %v2670_v6 = vld [vmem:[%s3465_s2] sm:$0xff]  ;;  %v2680_v8 = vld [vmem:[%s3465_s2 + $0x8] sm:$0xff]  ;;  %v2731_v35 = vld [vmem:[%s3465_s2 + $0x98] sm:$0xff]  ;;  %s2613_s11 = smov 124   ;;  %s2614_s12 = smov 122  }
   0x3   :  { %2103 = vmatprep.subr.mxu0 %v2604_v1  ;;  %2113 = vmatpush3.msra.mxu1 %v2648_v2  ;;  %v36_v9 = vld [vmem:[%s3466_s1] sm:$0xff]  ;;  %s2607_s1 = smov 64   ;;  %v2738_v36 = vld [vmem:[%s3465_s2 + $0x90] sm:$0xff]  ;;  %v2745_v37 = vld [vmem:[%s3465_s2 + $0x88] sm:$0xff]  ;;  %s2615_s5 = smov 120  }
   0x4   :  { %2104 = vmatpush3.msra.mxu0 %v2653_v3  ;;  %v125_v7 = vsub.s32 2, %v2658_v4  ;;  %2114 = vmatprep.subr.mxu1 %v2604_v1  ;;  %v113_v15 = vsub.s32 0, %v2658_v4  ;;  %v118_v16 = vsub.s32 1, %v2658_v4  ;;  %v2726_v34 = vld [vmem:[%s3465_s2 + $0xa0] sm:$0xff]  ;;  %v2759_v42 = vld [vmem:[%s3465_s2 + $0x78] sm:$0xff]  ;;  %v2766_v45 = vld [vmem:[%s3465_s2 + $0x70] sm:$0xff] }
   0x5   :  { %2105 = vmatprep.subr.mxu0 %v2604_v1  ;;  %2115 = vmatpush3.msra.mxu1 %v2653_v3  ;;  %v2752_v39 = vld [vmem:[%s3465_s2 + $0x80] sm:$0xff]  ;;  %v2775_v47 = vld [vmem:[%s3465_s2 + $0x68] sm:$0xff]  ;;  %v2791_v49 = vld [vmem:[%s3465_s2 + $0x58] sm:$0xff]  ;;  %v239_v58 = vsub.s32 3, %v2658_v4  ;;  %v245_v0 = vsub.s32 4, %v2658_v4  ;;  %v2611_v4 = vmov 0  }
   0x6   :  { %2106 = vmatpush3.msra.mxu0 %v2665_v5  ;;  %v2688_v10 = vrot.slane %v2670_v6, %v125_v7  ;;  %2116 = vmatprep.subr.mxu1 %v2604_v1  ;;  %v2712_v17 = vrot.slane %v2670_v6, %v113_v15  ;;  %v2715_v18 = vrot.slane %v2670_v6, %v118_v16  ;;  %v2784_v48 = vld [vmem:[%s3465_s2 + $0x60] sm:$0xff]  ;;  %v2798_v50 = vld [vmem:[%s3465_s2 + $0x50] sm:$0xff]  ;;  %v2805_v51 = vld [vmem:[%s3465_s2 + $0x48] sm:$0xff]  ;;  %s2618_s6 = smov 6   ;;  %s2619_s9 = smov 10  }
   0x7   :  { %2107 = vmatprep.subr.mxu0 %v2604_v1  ;;  %2117 = vmatpush3.msra.mxu1 %v2665_v5  ;;  %v2812_v52 = vld [vmem:[%s3465_s2 + $0x40] sm:$0xff]  ;;  %v2832_v54 = vld [vmem:[%s3465_s2 + $0x38] sm:$0xff]  ;;  %v2839_v55 = vld [vmem:[%s3465_s2 + $0x30] sm:$0xff]  ;;  %v2859_v59 = vrot.slane %v2670_v6, %v239_v58  ;;  %v2874_v7 = vrot.slane %v2670_v6, %v245_v0  ;;  %s2621_s10 = smov 8  }
   0x8   :  { %2108 = vmatpush3.msra.mxu0 %v2680_v8  ;;  %136 = vrot.lane.b32.xlu0 %v2688_v10, %s2606_s24  ;;  %v115_v19 = vmul.f32 0.0, %v2712_v17  ;;  %v120_v20 = vmul.f32 0.0, %v2715_v18  ;;  %v2846_v56 = vld [vmem:[%s3465_s2 + $0x28] sm:$0xff]  ;;  %v2853_v57 = vld [vmem:[%s3467_s0] sm:$0xff] }
   0x9   :  { %2110 = vmatmul.mubr.msk.f32.vlgmr.msra.gmra.mxu0 %vm37_vm1, %v36_v9  ;;  %2118 = vmatprep.subr.mxu1 %v2604_v1 }
   0xa   :  { %2119 = vmatpush3.msra.mxu1 %v2680_v8  ;;  %2120 = vmatprep.mubr.msk.f32.mxu1 %vm2605_vm0, %v2604_v1  ;;  %v121_v21 = vadd.f32 %v120_v20, %v115_v19 }
   0xb   :  { %2123 = vmatprep.subr.mxu0 %v2604_v1  ;;  %2155 = vmatprep.mubr.msk.f32.mxu0 %vm2605_vm0, %v2604_v1 }
   0xc   :  { %2158 = vmatprep.subr.mxu1 %v2604_v1  ;;  %v134_v30 = vadd.f32 %v2688_v10, %v121_v21  ;;  %2124 = vmatpush3.msra.mxu0 %v2726_v34 }
   0xd   :  { %2125 = vmatprep.subr.mxu0 %v2604_v1  ;;  %2500 = vset.pattern.permute.xlu0 %v2611_v4 }
   0xe   :  { %2126 = vmatpush3.msra.mxu0 %v2731_v35 }
   0xf   :  { %2127 = vmatprep.subr.mxu0 %v2604_v1 }
  0x10   :  { %2128 = vmatpush3.msra.mxu0 %v2738_v36 }
  0x11   :  { %2129 = vmatprep.subr.mxu0 %v2604_v1 }
  0x12   :  { %2130 = vmatpush3.msra.mxu0 %v2745_v37 }
  0x13   :  { %2131 = vmatprep.subr.mxu0 %v2604_v1 }
  0x14   :  { %2132 = vmatpush3.msra.mxu0 %v2752_v39 }
  0x15   :  { %2133 = vmatprep.subr.mxu0 %v2604_v1 }
  0x16   :  { %2134 = vmatpush3.msra.mxu0 %v2759_v42 }
  0x17   :  { %2135 = vmatprep.subr.mxu0 %v2604_v1 }
  0x18   :  { %2136 = vmatpush3.msra.mxu0 %v2766_v45 }
  0x19   :  { %2137 = vmatprep.subr.mxu0 %v2604_v1 }
  0x1a   :  { %2138 = vmatpush3.msra.mxu0 %v2775_v47 }
  0x1b   :  { %2139 = vmatprep.subr.mxu0 %v2604_v1 }
  0x1c   :  { %2140 = vmatpush3.msra.mxu0 %v2784_v48 }
  0x1d   :  { %2141 = vmatprep.subr.mxu0 %v2604_v1 }
  0x1e   :  { %2142 = vmatpush3.msra.mxu0 %v2791_v49 }
  0x1f   :  { %2143 = vmatprep.subr.mxu0 %v2604_v1 }
  0x20   :  { %2144 = vmatpush3.msra.mxu0 %v2798_v50 }
  0x21   :  { %2145 = vmatprep.subr.mxu0 %v2604_v1 }
  0x22   :  { %2146 = vmatpush3.msra.mxu0 %v2805_v51 }
  0x23   :  { %2147 = vmatprep.subr.mxu0 %v2604_v1 }
  0x24   :  { %2148 = vmatpush3.msra.mxu0 %v2812_v52 }
  0x25   :  { %2149 = vmatprep.subr.mxu0 %v2604_v1 }
  0x26   :  { %2150 = vmatpush3.msra.mxu0 %v2832_v54 }
  0x27   :  { %2151 = vmatprep.subr.mxu0 %v2604_v1 }
  0x28   :  { %2152 = vmatpush3.msra.mxu0 %v2839_v55 }
  0x29   :  { %2153 = vmatprep.subr.mxu0 %v2604_v1 }
  0x2a   :  { %2154 = vmatpush3.msra.mxu0 %v2846_v56 }
  0x2b   :  { %2204 = vmatprep.subr.mxu0 %v2604_v1 }
  0x7a   :  { %v2705_v11 = vpop.permute.xlu0 %136 }
  0xc9   :  { %v107_v12 = vpop.f32.mrf.mxu0 }
  0xca   :  { %v139_v13 = vadd.f32 %v2705_v11, %v107_v12  ;;  %v122_v22 = vadd.f32 %v121_v21, %v107_v12 }
  0xcb   :  { %v2111_v14 = vpop.f32.mrf.mxu0 }
  0xcc   :  { %141 = vrot.lane.b32.xlu0 %v139_v13, %s2607_s1  ;;  %v127_v23 = vadd.f32 %v2688_v10, %v122_v22 }
  0xce   :  { %v1904_v24 = vmul.f32 -1.442695, %v127_v23 }
  0xd0   :  { %157 = vrot.lane.b32.xlu0 %v36_v9, %s2608_s25  ;;  %2503 = vpow2.f32 %v1904_v24  ;;  %v2610_v24 = vmov 1  }
  0xd1   :  { %2501 = vset.pattern.permute.xlu1 %v2610_v24 }
  0xd4   :  { %337 = vrot.lane.b32.xlu0 %v2853_v57, %s2609_s7 }
  0xdd   :  { %v2504_v25 = vpop.eup %2503 }
  0xde   :  { %v131_v26 = vadd.f32 1.0, %v2504_v25 }
  0xe0   :  { %2505 = vrcp.f32 %v131_v26 }
  0xed   :  { %v2506_v27 = vpop.eup %2505 }
  0xee   :  { %v151_v40 = vsub.f32 1.0, %v2506_v27 }
 0x13e   :  { %v142_v28 = vpop.permute.xlu0 %141 }
 0x13f   :  { %v144_v29 = vmul.f32 %v2506_v27, %v142_v28 }
 0x141   :  { %146 = vrot.lane.b32.xlu1 %v144_v29, %s2607_s1 }
 0x142   :  { %v158_v38 = vpop.permute.xlu0 %157 }
 0x143   :  { %v160_v43 = vmul.f32 %v2506_v27, %v158_v38 }
 0x1b3   :  { %v147_v31 = vpop.permute.xlu1 %146 }
 0x1b4   :  { %v149_v32 = vadd.f32 %v147_v31, %v134_v30  ;;  %v338_v31 = vpop.permute.xlu0 %337 }
 0x1b6   :  { %2507 = vtanh.f32 %v149_v32 }
 0x1c3   :  { %v2508_v33 = vpop.eup %2507 }
 0x1c4   :  { %153 = vrot.lane.b32.xlu1 %v2508_v33, %s2606_s24 }
 0x236   :  { %v154_v41 = vpop.permute.xlu1 %153 }
 0x237   :  { %v156_v44 = vmul.f32 %v154_v41, %v151_v40 }
 0x239   :  { %v2768_v46 = vadd.f32 %v160_v43, %v156_v44 }
 0x23b   :  { %163 = vrot.lane.b32.xlu1 %v2768_v46, %s2606_s24 }
 0x2ad   :  { %v164_v53 = vpop.permute.xlu1 %163 }
 0x2ae   :  { %2121 = vmatmul.mubr.msk.f32.vlgmr.msra.gmra.mxu1 %vm37_vm1, %v164_v53 }
 0x2af   :  { %2159 = vmatpush3.msra.mxu1 %v2648_v2  ;;  %2166 = vmatprep.mubr.msk.f32.mxu1 %vm2605_vm0, %v2604_v1 }
 0x2b0   :  { %2160 = vmatprep.subr.mxu1 %v2604_v1 }
 0x2b1   :  { %2161 = vmatpush3.msra.mxu1 %v2653_v3 }
 0x2b2   :  { %2162 = vmatprep.subr.mxu1 %v2604_v1 }
 0x2b3   :  { %2163 = vmatpush3.msra.mxu1 %v2665_v5 }
 0x2b4   :  { %2164 = vmatprep.subr.mxu1 %v2604_v1 }
 0x2b5   :  { %2165 = vmatpush3.msra.mxu1 %v2680_v8 }
 0x2b6   :  { %2169 = vmatprep.subr.mxu1 %v2604_v1 }
 0x36e   :  { %v233_v60 = vpop.f32.mrf.mxu1 }
 0x36f   :  { %v241_v61 = vadd.f32 %v2859_v59, %v233_v60  ;;  %v369_v41 = vadd.f32 %v233_v60, %v2705_v11 }
 0x370   :  { %v2122_v62 = vpop.f32.mrf.mxu1 }
 0x371   :  { %v242_v63 = vmax.f32 %v241_v61, 0.0 }
 0x373   :  { %2156 = vmatmul.mubr.f32.vlgmr.msra.gmra.mxu0 %v242_v63 }
 0x374   :  { %2205 = vmatpush3.msra.mxu0 %v2648_v2  ;;  %2212 = vmatprep.mubr.msk.f32.mxu0 %vm2605_vm0, %v2604_v1 }
 0x375   :  { %2206 = vmatprep.subr.mxu0 %v2604_v1 }
 0x376   :  { %2207 = vmatpush3.msra.mxu0 %v2653_v3 }
 0x377   :  { %2208 = vmatprep.subr.mxu0 %v2604_v1 }
 0x378   :  { %2209 = vmatpush3.msra.mxu0 %v2665_v5 }
 0x379   :  { %2210 = vmatprep.subr.mxu0 %v2604_v1 }
 0x37a   :  { %2211 = vmatpush3.msra.mxu0 %v2680_v8 }
 0x37b   :  { %2215 = vmatprep.subr.mxu0 %v2604_v1 }
 0x433   :  { %v313_v9 = vpop.f32.mrf.mxu0 }
 0x434   :  { %v314_v12 = vadd.f32 %v313_v9, %v2874_v7 }
 0x435   :  { %v2157_v13 = vpop.f32.mrf.mxu0 }
 0x436   :  { %v320_v14 = vand.u32 2147483647, %v314_v12  ;;  %v317_v27 = vmax.f32 %v314_v12, 0.0  ;;  %vm318_vm3 = vcmp.ne.f32.partialorder %v314_v12, %v314_v12 }
 0x438   :  { %v321_v15 = vsub.f32 0.0, %v320_v14 }
 0x43a   :  { %v322_v16 = vmul.f32 1.442695, %v321_v15 }
 0x43c   :  { %2509 = vpow2.f32 %v322_v16 }
 0x449   :  { %v2510_v19 = vpop.eup %2509 }
 0x44a   :  { %v324_v20 = vadd.f32 1.0, %v2510_v19  ;;  %v327_v21 = vmul.f32 -0.5, %v2510_v19  ;;  %v330_v23 = vand.u32 2147483647, %v2510_v19 }
 0x44c   :  { %2511 = vlog2.f32 %v324_v20  ;;  %v328_v22 = vadd.f32 1.0, %v327_v21  ;;  %vm331_vm2 = vcmp.lt.f32.partialorder %v330_v23, 0.0004427343 }
 0x44e   :  { %v329_v26 = vmul.f32 %v2510_v19, %v328_v22 }
 0x459   :  { %v2512_v6 = vpop.eup %2511 }
 0x45a   :  { %v326_v25 = vmul.f32 0.6931472, %v2512_v6 }
 0x45c   :  { %v332_v28 = vsel %vm331_vm2, %v329_v26, %v326_v25 }
 0x45d   :  { %v333_v29 = vadd.f32 %v332_v28, %v317_v27 }
 0x45f   :  { %v334_v30 = vsel %vm318_vm3, %v314_v12, %v333_v29  ;;  %vm566_vm3 = vcmask 31760  }
 0x460   :  { %v335_v32 = vadd.f32 0.001, %v334_v30 }
 0x462   :  { %v340_v33 = vmul.f32 %v338_v31, %v335_v32 }
 0x464   :  { %342 = vrot.lane.b32.xlu1 %v340_v33, %s2612_s8 }
 0x4d6   :  { %v343_v38 = vpop.permute.xlu1 %342 }
 0x4d7   :  { %v2879_v40 = vadd.f32 %v343_v38, %v314_v12 }
 0x4d9   :  { %355 = vperm.xlu1 %2501, %v2879_v40   ;;  %350 = vperm.xlu0 %2500, %v2879_v40   ;;  %347 = vst.msk [vmem:[%s3468_s3] sm:$0xff] %vm346_vm4, %v2879_v40  ;;  %vm788_vm4 = vcmask 48160  }
 0x4dd   :  { %371 = vrot.lane.b32.xlu1 %v369_v41, %s2607_s1 }
 0x554   :  { %v356_v43 = vpop.permute.xlu1 %355  ;;  %v351_v44 = vpop.permute.xlu0 %350 }
 0x555   :  { %v358_v53 = vmul.f32 %v356_v43, %v2715_v18  ;;  %v353_v58 = vmul.f32 %v351_v44, %v2712_v17 }
 0x557   :  { %v359_v61 = vadd.f32 %v358_v53, %v353_v58 }
 0x558   :  { %v372_v14 = vpop.permute.xlu1 %371 }
 0x559   :  { %v360_v62 = vadd.f32 %v359_v61, %v233_v60  ;;  %v368_v16 = vadd.f32 %v359_v61, %v2688_v10 }
 0x55b   :  { %v361_v63 = vadd.f32 %v360_v62, %v2688_v10 }
 0x55d   :  { %v1906_v0 = vmul.f32 -1.442695, %v361_v63 }
 0x55f   :  { %2513 = vpow2.f32 %v1906_v0 }
 0x56c   :  { %v2514_v9 = vpop.eup %2513 }
 0x56d   :  { %v365_v12 = vadd.f32 1.0, %v2514_v9 }
 0x56f   :  { %2515 = vrcp.f32 %v365_v12 }
 0x57c   :  { %v2516_v13 = vpop.eup %2515 }
 0x57d   :  { %v374_v15 = vmul.f32 %v2516_v13, %v372_v14  ;;  %v381_v60 = vsub.f32 1.0, %v2516_v13  ;;  %v387_v23 = vmul.f32 %v2516_v13, %v2768_v46 }
 0x57f   :  { %376 = vrot.lane.b32.xlu0 %v374_v15, %s2607_s1 }
 0x5f1   :  { %v377_v19 = vpop.permute.xlu0 %376 }
 0x5f2   :  { %v379_v20 = vadd.f32 %v377_v19, %v368_v16 }
 0x5f4   :  { %2517 = vtanh.f32 %v379_v20 }
 0x601   :  { %v2518_v21 = vpop.eup %2517 }
 0x602   :  { %383 = vrot.lane.b32.xlu1 %v2518_v21, %s2606_s24 }
 0x674   :  { %v384_v22 = vpop.permute.xlu1 %383 }
 0x675   :  { %v386_v4 = vmul.f32 %v384_v22, %v381_v60 }
 0x677   :  { %v2896_v6 = vadd.f32 %v387_v23, %v386_v4 }
 0x679   :  { %390 = vrot.lane.b32.xlu0 %v2896_v6, %s2606_s24 }
 0x6eb   :  { %v391_v25 = vpop.permute.xlu0 %390 }
 0x6ec   :  { %2167 = vmatmul.mubr.msk.f32.vlgmr.msra.gmra.mxu1 %vm37_vm1, %v391_v25 }
 0x6ed   :  { %2170 = vmatpush3.msra.mxu1 %v2726_v34  ;;  %2201 = vmatprep.mubr.msk.f32.mxu1 %vm2605_vm0, %v2604_v1 }
 0x6ee   :  { %2171 = vmatprep.subr.mxu1 %v2604_v1 }
 0x6ef   :  { %2172 = vmatpush3.msra.mxu1 %v2731_v35 }
 0x6f0   :  { %2173 = vmatprep.subr.mxu1 %v2604_v1 }
 0x6f1   :  { %2174 = vmatpush3.msra.mxu1 %v2738_v36 }
 0x6f2   :  { %2175 = vmatprep.subr.mxu1 %v2604_v1 }
 0x6f3   :  { %2176 = vmatpush3.msra.mxu1 %v2745_v37 }
 0x6f4   :  { %2177 = vmatprep.subr.mxu1 %v2604_v1 }
 0x6f5   :  { %2178 = vmatpush3.msra.mxu1 %v2752_v39 }
 0x6f6   :  { %2179 = vmatprep.subr.mxu1 %v2604_v1 }
 0x6f7   :  { %2180 = vmatpush3.msra.mxu1 %v2759_v42 }
 0x6f8   :  { %2181 = vmatprep.subr.mxu1 %v2604_v1 }
 0x6f9   :  { %2182 = vmatpush3.msra.mxu1 %v2766_v45 }
 0x6fa   :  { %2183 = vmatprep.subr.mxu1 %v2604_v1 }
 0x6fb   :  { %2184 = vmatpush3.msra.mxu1 %v2775_v47 }
 0x6fc   :  { %2185 = vmatprep.subr.mxu1 %v2604_v1 }
 0x6fd   :  { %2186 = vmatpush3.msra.mxu1 %v2784_v48 }
 0x6fe   :  { %2187 = vmatprep.subr.mxu1 %v2604_v1 }
 0x6ff   :  { %2188 = vmatpush3.msra.mxu1 %v2791_v49 }
 0x700   :  { %2189 = vmatprep.subr.mxu1 %v2604_v1 }
 0x701   :  { %2190 = vmatpush3.msra.mxu1 %v2798_v50 }
 0x702   :  { %2191 = vmatprep.subr.mxu1 %v2604_v1 }
 0x703   :  { %2192 = vmatpush3.msra.mxu1 %v2805_v51 }
 0x704   :  { %2193 = vmatprep.subr.mxu1 %v2604_v1 }
 0x705   :  { %2194 = vmatpush3.msra.mxu1 %v2812_v52 }
 0x706   :  { %2195 = vmatprep.subr.mxu1 %v2604_v1 }
 0x707   :  { %2196 = vmatpush3.msra.mxu1 %v2832_v54 }
 0x708   :  { %2197 = vmatprep.subr.mxu1 %v2604_v1 }
 0x709   :  { %2198 = vmatpush3.msra.mxu1 %v2839_v55 }
 0x70a   :  { %2199 = vmatprep.subr.mxu1 %v2604_v1 }
 0x70b   :  { %2200 = vmatpush3.msra.mxu1 %v2846_v56 }
 0x70c   :  { %2250 = vmatprep.subr.mxu1 %v2604_v1 }
 0x7ac   :  { %v460_v46 = vpop.f32.mrf.mxu1 }
 0x7ad   :  { %v464_v26 = vadd.f32 %v460_v46, %v2859_v59  ;;  %v588_v21 = vadd.f32 %v460_v46, %v2705_v11 }
 0x7ae   :  { %v2168_v27 = vpop.f32.mrf.mxu1 }
 0x7af   :  { %v465_v28 = vmax.f32 %v464_v26, 0.0 }
 0x7b1   :  { %2202 = vmatmul.mubr.f32.vlgmr.msra.gmra.mxu1 %v465_v28 }
 0x7b2   :  { %2251 = vmatpush3.msra.mxu1 %v2648_v2  ;;  %2258 = vmatprep.mubr.msk.f32.mxu1 %vm2605_vm0, %v2604_v1 }
 0x7b3   :  { %2252 = vmatprep.subr.mxu1 %v2604_v1 }
 0x7b4   :  { %2253 = vmatpush3.msra.mxu1 %v2653_v3 }
 0x7b5   :  { %2254 = vmatprep.subr.mxu1 %v2604_v1 }
 0x7b6   :  { %2255 = vmatpush3.msra.mxu1 %v2665_v5 }
 0x7b7   :  { %2256 = vmatprep.subr.mxu1 %v2604_v1 }
 0x7b8   :  { %2257 = vmatpush3.msra.mxu1 %v2680_v8 }
 0x7b9   :  { %2261 = vmatprep.subr.mxu1 %v2604_v1 }
 0x871   :  { %v532_v29 = vpop.f32.mrf.mxu1 }
 0x872   :  { %v533_v30 = vadd.f32 %v532_v29, %v2874_v7 }
 0x873   :  { %v2203_v31 = vpop.f32.mrf.mxu1 }
 0x874   :  { %v539_v32 = vand.u32 2147483647, %v533_v30  ;;  %v536_v0 = vmax.f32 %v533_v30, 0.0  ;;  %vm537_vm6 = vcmp.ne.f32.partialorder %v533_v30, %v533_v30  ;;  %v555_v16 = vadd.f32 %v533_v30, %v2879_v40 }
 0x876   :  { %v540_v33 = vsub.f32 0.0, %v539_v32 }
 0x878   :  { %v541_v38 = vmul.f32 1.442695, %v540_v33 }
 0x87a   :  { %2519 = vpow2.f32 %v541_v38 }
 0x887   :  { %v2520_v41 = vpop.eup %2519 }
 0x888   :  { %v543_v43 = vadd.f32 1.0, %v2520_v41  ;;  %v546_v44 = vmul.f32 -0.5, %v2520_v41  ;;  %v549_v58 = vand.u32 2147483647, %v2520_v41 }
 0x88a   :  { %2521 = vlog2.f32 %v543_v43  ;;  %v547_v53 = vadd.f32 1.0, %v546_v44  ;;  %vm550_vm5 = vcmp.lt.f32.partialorder %v549_v58, 0.0004427343 }
 0x88c   :  { %v548_v63 = vmul.f32 %v2520_v41, %v547_v53 }
 0x897   :  { %v2522_v61 = vpop.eup %2521 }
 0x898   :  { %v545_v62 = vmul.f32 0.6931472, %v2522_v61 }
 0x89a   :  { %v551_v9 = vsel %vm550_vm5, %v548_v63, %v545_v62  ;;  %vm1010_vm5 = vcmask 64560  }
 0x89b   :  { %v552_v12 = vadd.f32 %v551_v9, %v536_v0 }
 0x89d   :  { %v553_v13 = vsel %vm537_vm6, %v533_v30, %v552_v12  ;;  %vm1232_vm6 = vcmask 80960  }
 0x89e   :  { %v554_v14 = vadd.f32 0.001, %v553_v13 }
 0x8a0   :  { %v556_v15 = vmul.f32 %v554_v14, %v2853_v57 }
 0x8a2   :  { %558 = vrot.lane.b32.xlu1 %v556_v15, %s2612_s8 }
 0x914   :  { %v559_v19 = vpop.permute.xlu1 %558 }
 0x915   :  { %v2950_v20 = vadd.f32 %v559_v19, %v555_v16 }
 0x917   :  { %574 = vperm.xlu1 %2501, %v2950_v20   ;;  %569 = vperm.xlu0 %2500, %v2950_v20  }
 0x91b   :  { %590 = vrot.lane.b32.xlu0 %v588_v21, %s2607_s1 }
 0x992   :  { %v575_v60 = vpop.permute.xlu1 %574  ;;  %v570_v22 = vpop.permute.xlu0 %569 }
 0x993   :  { %v577_v23 = vmul.f32 %v575_v60, %v2715_v18  ;;  %v572_v4 = vmul.f32 %v570_v22, %v2712_v17 }
 0x995   :  { %v578_v25 = vadd.f32 %v577_v23, %v572_v4 }
 0x996   :  { %v591_v31 = vpop.permute.xlu0 %590 }
 0x997   :  { %v579_v26 = vadd.f32 %v578_v25, %v460_v46  ;;  %v587_v33 = vadd.f32 %v578_v25, %v2688_v10 }
 0x999   :  { %v580_v40 = vadd.f32 %v579_v26, %v2688_v10 }
 0x99b   :  { %v1908_v27 = vmul.f32 -1.442695, %v580_v40 }
 0x99d   :  { %2523 = vpow2.f32 %v1908_v27 }
 0x9aa   :  { %v2524_v28 = vpop.eup %2523 }
 0x9ab   :  { %v584_v29 = vadd.f32 1.0, %v2524_v28 }
 0x9ad   :  { %2525 = vrcp.f32 %v584_v29 }
 0x9ba   :  { %v2526_v30 = vpop.eup %2525 }
 0x9bb   :  { %v593_v32 = vmul.f32 %v2526_v30, %v591_v31  ;;  %v600_v46 = vsub.f32 1.0, %v2526_v30  ;;  %v606_v53 = vmul.f32 %v2526_v30, %v2896_v6 }
 0x9bd   :  { %595 = vrot.lane.b32.xlu1 %v593_v32, %s2607_s1 }
 0xa2f   :  { %v596_v38 = vpop.permute.xlu1 %595 }
 0xa30   :  { %v598_v41 = vadd.f32 %v596_v38, %v587_v33 }
 0xa32   :  { %2527 = vtanh.f32 %v598_v41 }
 0xa3f   :  { %v2528_v43 = vpop.eup %2527 }
 0xa40   :  { %602 = vrot.lane.b32.xlu0 %v2528_v43, %s2606_s24 }
 0xa44   :  { %775 = vrot.lane.b32.xlu0 %v2853_v57, %s2612_s8 }
 0xab2   :  { %v603_v44 = vpop.permute.xlu0 %602 }
 0xab3   :  { %v605_v58 = vmul.f32 %v603_v44, %v600_v46 }
 0xab5   :  { %v2965_v61 = vadd.f32 %v606_v53, %v605_v58 }
 0xab6   :  { %v776_v31 = vpop.permute.xlu0 %775 }
 0xab7   :  { %609 = vrot.lane.b32.xlu1 %v2965_v61, %s2606_s24 }
 0xb29   :  { %v610_v62 = vpop.permute.xlu1 %609 }
 0xb2a   :  { %2213 = vmatmul.mubr.msk.f32.vlgmr.msra.gmra.mxu0 %vm37_vm1, %v610_v62 }
 0xb2b   :  { %2216 = vmatpush3.msra.mxu0 %v2726_v34  ;;  %2247 = vmatprep.mubr.msk.f32.mxu0 %vm2605_vm0, %v2604_v1 }
 0xb2c   :  { %2217 = vmatprep.subr.mxu0 %v2604_v1 }
 0xb2d   :  { %2218 = vmatpush3.msra.mxu0 %v2731_v35 }
 0xb2e   :  { %2219 = vmatprep.subr.mxu0 %v2604_v1 }
 0xb2f   :  { %2220 = vmatpush3.msra.mxu0 %v2738_v36 }
 0xb30   :  { %2221 = vmatprep.subr.mxu0 %v2604_v1 }
 0xb31   :  { %2222 = vmatpush3.msra.mxu0 %v2745_v37 }
 0xb32   :  { %2223 = vmatprep.subr.mxu0 %v2604_v1 }
 0xb33   :  { %2224 = vmatpush3.msra.mxu0 %v2752_v39 }
 0xb34   :  { %2225 = vmatprep.subr.mxu0 %v2604_v1 }
 0xb35   :  { %2226 = vmatpush3.msra.mxu0 %v2759_v42 }
 0xb36   :  { %2227 = vmatprep.subr.mxu0 %v2604_v1 }
 0xb37   :  { %2228 = vmatpush3.msra.mxu0 %v2766_v45 }
 0xb38   :  { %2229 = vmatprep.subr.mxu0 %v2604_v1 }
 0xb39   :  { %2230 = vmatpush3.msra.mxu0 %v2775_v47 }
 0xb3a   :  { %2231 = vmatprep.subr.mxu0 %v2604_v1 }
 0xb3b   :  { %2232 = vmatpush3.msra.mxu0 %v2784_v48 }
 0xb3c   :  { %2233 = vmatprep.subr.mxu0 %v2604_v1 }
 0xb3d   :  { %2234 = vmatpush3.msra.mxu0 %v2791_v49 }
 0xb3e   :  { %2235 = vmatprep.subr.mxu0 %v2604_v1 }
 0xb3f   :  { %2236 = vmatpush3.msra.mxu0 %v2798_v50 }
 0xb40   :  { %2237 = vmatprep.subr.mxu0 %v2604_v1 }
 0xb41   :  { %2238 = vmatpush3.msra.mxu0 %v2805_v51 }
 0xb42   :  { %2239 = vmatprep.subr.mxu0 %v2604_v1 }
 0xb43   :  { %2240 = vmatpush3.msra.mxu0 %v2812_v52 }
 0xb44   :  { %2241 = vmatprep.subr.mxu0 %v2604_v1 }
 0xb45   :  { %2242 = vmatpush3.msra.mxu0 %v2832_v54 }
 0xb46   :  { %2243 = vmatprep.subr.mxu0 %v2604_v1 }
 0xb47   :  { %2244 = vmatpush3.msra.mxu0 %v2839_v55 }
 0xb48   :  { %2245 = vmatprep.subr.mxu0 %v2604_v1 }
 0xb49   :  { %2246 = vmatpush3.msra.mxu0 %v2846_v56 }
 0xb4a   :  { %2296 = vmatprep.subr.mxu0 %v2604_v1 }
 0xbea   :  { %v679_v6 = vpop.f32.mrf.mxu0 }
 0xbeb   :  { %v683_v63 = vadd.f32 %v679_v6, %v2859_v59  ;;  %v810_v46 = vadd.f32 %v679_v6, %v2705_v11 }
 0xbec   :  { %v2214_v0 = vpop.f32.mrf.mxu0 }
 0xbed   :  { %v684_v9 = vmax.f32 %v683_v63, 0.0 }
 0xbef   :  { %2248 = vmatmul.mubr.f32.vlgmr.msra.gmra.mxu0 %v684_v9 }
 0xbf0   :  { %2297 = vmatpush3.msra.mxu0 %v2648_v2  ;;  %2304 = vmatprep.mubr.msk.f32.mxu0 %vm2605_vm0, %v2604_v1 }
 0xbf1   :  { %2298 = vmatprep.subr.mxu0 %v2604_v1 }
 0xbf2   :  { %2299 = vmatpush3.msra.mxu0 %v2653_v3 }
 0xbf3   :  { %2300 = vmatprep.subr.mxu0 %v2604_v1 }
 0xbf4   :  { %2301 = vmatpush3.msra.mxu0 %v2665_v5 }
 0xbf5   :  { %2302 = vmatprep.subr.mxu0 %v2604_v1 }
 0xbf6   :  { %2303 = vmatpush3.msra.mxu0 %v2680_v8 }
 0xbf7   :  { %2307 = vmatprep.subr.mxu0 %v2604_v1 }
 0xcaf   :  { %v751_v12 = vpop.f32.mrf.mxu0 }
 0xcb0   :  { %v752_v13 = vadd.f32 %v751_v12, %v2874_v7 }
 0xcb1   :  { %v2249_v14 = vpop.f32.mrf.mxu0 }
 0xcb2   :  { %v758_v15 = vand.u32 2147483647, %v752_v13  ;;  %v755_v27 = vmax.f32 %v752_v13, 0.0  ;;  %vm756_vm8 = vcmp.ne.f32.partialorder %v752_v13, %v752_v13  ;;  %v774_v38 = vadd.f32 %v752_v13, %v2950_v20 }
 0xcb4   :  { %v759_v16 = vsub.f32 0.0, %v758_v15 }
 0xcb6   :  { %v760_v19 = vmul.f32 1.442695, %v759_v16 }
 0xcb8   :  { %2529 = vpow2.f32 %v760_v19 }
 0xcc5   :  { %v2530_v21 = vpop.eup %2529 }
 0xcc6   :  { %v762_v60 = vadd.f32 1.0, %v2530_v21  ;;  %v765_v22 = vmul.f32 -0.5, %v2530_v21  ;;  %v768_v4 = vand.u32 2147483647, %v2530_v21 }
 0xcc8   :  { %2531 = vlog2.f32 %v762_v60  ;;  %v766_v23 = vadd.f32 1.0, %v765_v22  ;;  %vm769_vm7 = vcmp.lt.f32.partialorder %v768_v4, 0.0004427343 }
 0xcca   :  { %v767_v40 = vmul.f32 %v2530_v21, %v766_v23 }
 0xcd5   :  { %v2532_v25 = vpop.eup %2531 }
 0xcd6   :  { %v764_v26 = vmul.f32 0.6931472, %v2532_v25 }
 0xcd8   :  { %v770_v28 = vsel %vm769_vm7, %v767_v40, %v764_v26  ;;  %vm1454_vm7 = vcmask 97360  }
 0xcd9   :  { %v771_v29 = vadd.f32 %v770_v28, %v755_v27 }
 0xcdb   :  { %v772_v30 = vsel %vm756_vm8, %v752_v13, %v771_v29  ;;  %vm1676_vm8 = vcmask 113760  }
 0xcdc   :  { %v773_v32 = vadd.f32 0.001, %v772_v30 }
 0xcde   :  { %v778_v33 = vmul.f32 %v776_v31, %v773_v32 }
 0xce0   :  { %780 = vrot.lane.b32.xlu1 %v778_v33, %s2612_s8 }
 0xd52   :  { %v781_v41 = vpop.permute.xlu1 %780 }
 0xd53   :  { %v3018_v43 = vadd.f32 %v781_v41, %v774_v38 }
 0xd55   :  { %796 = vperm.xlu1 %2501, %v3018_v43   ;;  %791 = vperm.xlu0 %2500, %v3018_v43  }
 0xd59   :  { %812 = vrot.lane.b32.xlu0 %v810_v46, %s2607_s1 }
 0xdd0   :  { %v797_v44 = vpop.permute.xlu1 %796  ;;  %v792_v53 = vpop.permute.xlu0 %791 }
 0xdd1   :  { %v799_v58 = vmul.f32 %v797_v44, %v2715_v18  ;;  %v794_v62 = vmul.f32 %v792_v53, %v2712_v17 }
 0xdd3   :  { %v800_v63 = vadd.f32 %v799_v58, %v794_v62 }
 0xdd4   :  { %v813_v16 = vpop.permute.xlu0 %812 }
 0xdd5   :  { %v801_v0 = vadd.f32 %v800_v63, %v679_v6  ;;  %v809_v21 = vadd.f32 %v800_v63, %v2688_v10 }
 0xdd7   :  { %v802_v9 = vadd.f32 %v801_v0, %v2688_v10 }
 0xdd9   :  { %v1910_v12 = vmul.f32 -1.442695, %v802_v9 }
 0xddb   :  { %2533 = vpow2.f32 %v1910_v12 }
 0xde8   :  { %v2534_v13 = vpop.eup %2533 }
 0xde9   :  { %v806_v14 = vadd.f32 1.0, %v2534_v13 }
 0xdeb   :  { %2535 = vrcp.f32 %v806_v14 }
 0xdf8   :  { %v2536_v15 = vpop.eup %2535 }
 0xdf9   :  { %v815_v19 = vmul.f32 %v2536_v15, %v813_v16  ;;  %v822_v6 = vsub.f32 1.0, %v2536_v15  ;;  %v828_v25 = vmul.f32 %v2536_v15, %v2965_v61 }
 0xdfb   :  { %817 = vrot.lane.b32.xlu1 %v815_v19, %s2607_s1 }
 0xe6d   :  { %v818_v60 = vpop.permute.xlu1 %817 }
 0xe6e   :  { %v820_v22 = vadd.f32 %v818_v60, %v809_v21 }
 0xe70   :  { %2537 = vtanh.f32 %v820_v22 }
 0xe7d   :  { %v2538_v23 = vpop.eup %2537 }
 0xe7e   :  { %824 = vrot.lane.b32.xlu0 %v2538_v23, %s2606_s24 }
 0xe82   :  { %997 = vrot.lane.b32.xlu0 %v2853_v57, %s2613_s11  ;;  %s2622_s11 = smov 12  }
 0xef0   :  { %v825_v4 = vpop.permute.xlu0 %824 }
 0xef1   :  { %v827_v26 = vmul.f32 %v825_v4, %v822_v6 }
 0xef3   :  { %v3031_v40 = vadd.f32 %v828_v25, %v827_v26 }
 0xef4   :  { %v998_v12 = vpop.permute.xlu0 %997 }
 0xef5   :  { %831 = vrot.lane.b32.xlu1 %v3031_v40, %s2606_s24 }
 0xf67   :  { %v832_v27 = vpop.permute.xlu1 %831 }
 0xf68   :  { %2259 = vmatmul.mubr.msk.f32.vlgmr.msra.gmra.mxu1 %vm37_vm1, %v832_v27 }
 0xf69   :  { %2262 = vmatpush3.msra.mxu1 %v2726_v34  ;;  %2293 = vmatprep.mubr.msk.f32.mxu1 %vm2605_vm0, %v2604_v1 }
 0xf6a   :  { %2263 = vmatprep.subr.mxu1 %v2604_v1 }
 0xf6b   :  { %2264 = vmatpush3.msra.mxu1 %v2731_v35 }
 0xf6c   :  { %2265 = vmatprep.subr.mxu1 %v2604_v1 }
 0xf6d   :  { %2266 = vmatpush3.msra.mxu1 %v2738_v36 }
 0xf6e   :  { %2267 = vmatprep.subr.mxu1 %v2604_v1 }
 0xf6f   :  { %2268 = vmatpush3.msra.mxu1 %v2745_v37 }
 0xf70   :  { %2269 = vmatprep.subr.mxu1 %v2604_v1 }
 0xf71   :  { %2270 = vmatpush3.msra.mxu1 %v2752_v39 }
 0xf72   :  { %2271 = vmatprep.subr.mxu1 %v2604_v1 }
 0xf73   :  { %2272 = vmatpush3.msra.mxu1 %v2759_v42 }
 0xf74   :  { %2273 = vmatprep.subr.mxu1 %v2604_v1 }
 0xf75   :  { %2274 = vmatpush3.msra.mxu1 %v2766_v45 }
 0xf76   :  { %2275 = vmatprep.subr.mxu1 %v2604_v1 }
 0xf77   :  { %2276 = vmatpush3.msra.mxu1 %v2775_v47 }
 0xf78   :  { %2277 = vmatprep.subr.mxu1 %v2604_v1 }
 0xf79   :  { %2278 = vmatpush3.msra.mxu1 %v2784_v48 }
 0xf7a   :  { %2279 = vmatprep.subr.mxu1 %v2604_v1 }
 0xf7b   :  { %2280 = vmatpush3.msra.mxu1 %v2791_v49 }
 0xf7c   :  { %2281 = vmatprep.subr.mxu1 %v2604_v1 }
 0xf7d   :  { %2282 = vmatpush3.msra.mxu1 %v2798_v50 }
 0xf7e   :  { %2283 = vmatprep.subr.mxu1 %v2604_v1 }
 0xf7f   :  { %2284 = vmatpush3.msra.mxu1 %v2805_v51 }
 0xf80   :  { %2285 = vmatprep.subr.mxu1 %v2604_v1 }
 0xf81   :  { %2286 = vmatpush3.msra.mxu1 %v2812_v52 }
 0xf82   :  { %2287 = vmatprep.subr.mxu1 %v2604_v1 }
 0xf83   :  { %2288 = vmatpush3.msra.mxu1 %v2832_v54 }
 0xf84   :  { %2289 = vmatprep.subr.mxu1 %v2604_v1 }
 0xf85   :  { %2290 = vmatpush3.msra.mxu1 %v2839_v55 }
 0xf86   :  { %2291 = vmatprep.subr.mxu1 %v2604_v1 }
 0xf87   :  { %2292 = vmatpush3.msra.mxu1 %v2846_v56 }
 0xf88   :  { %2342 = vmatprep.subr.mxu1 %v2604_v1 }
0x1028   :  { %v901_v61 = vpop.f32.mrf.mxu1 }
0x1029   :  { %v905_v28 = vadd.f32 %v901_v61, %v2859_v59  ;;  %v1032_v60 = vadd.f32 %v901_v61, %v2705_v11 }
0x102a   :  { %v2260_v29 = vpop.f32.mrf.mxu1 }
0x102b   :  { %v906_v30 = vmax.f32 %v905_v28, 0.0 }
0x102d   :  { %2294 = vmatmul.mubr.f32.vlgmr.msra.gmra.mxu1 %v906_v30 }
0x102e   :  { %2343 = vmatpush3.msra.mxu1 %v2648_v2  ;;  %2350 = vmatprep.mubr.msk.f32.mxu1 %vm2605_vm0, %v2604_v1 }
0x102f   :  { %2344 = vmatprep.subr.mxu1 %v2604_v1 }
0x1030   :  { %2345 = vmatpush3.msra.mxu1 %v2653_v3 }
0x1031   :  { %2346 = vmatprep.subr.mxu1 %v2604_v1 }
0x1032   :  { %2347 = vmatpush3.msra.mxu1 %v2665_v5 }
0x1033   :  { %2348 = vmatprep.subr.mxu1 %v2604_v1 }
0x1034   :  { %2349 = vmatpush3.msra.mxu1 %v2680_v8 }
0x1035   :  { %2353 = vmatprep.subr.mxu1 %v2604_v1 }
0x10ed   :  { %v973_v31 = vpop.f32.mrf.mxu1 }
0x10ee   :  { %v974_v2 = vadd.f32 %v973_v31, %v2874_v7 }
0x10ef   :  { %v2295_v32 = vpop.f32.mrf.mxu1 }
0x10f0   :  { %v980_v33 = vand.u32 2147483647, %v974_v2  ;;  %v977_v8 = vmax.f32 %v974_v2, 0.0  ;;  %vm978_vm10 = vcmp.ne.f32.partialorder %v974_v2, %v974_v2  ;;  %v996_v16 = vadd.f32 %v974_v2, %v3018_v43 }
0x10f2   :  { %v981_v38 = vsub.f32 0.0, %v980_v33 }
0x10f4   :  { %v982_v41 = vmul.f32 1.442695, %v981_v38 }
0x10f6   :  { %2539 = vpow2.f32 %v982_v41 }
0x1103   :  { %v2540_v46 = vpop.eup %2539 }
0x1104   :  { %v984_v3 = vadd.f32 1.0, %v2540_v46  ;;  %v987_v44 = vmul.f32 -0.5, %v2540_v46  ;;  %v990_v5 = vand.u32 2147483647, %v2540_v46 }
0x1106   :  { %2541 = vlog2.f32 %v984_v3  ;;  %v988_v53 = vadd.f32 1.0, %v987_v44  ;;  %vm991_vm9 = vcmp.lt.f32.partialorder %v990_v5, 0.0004427343 }
0x1108   :  { %v989_v63 = vmul.f32 %v2540_v46, %v988_v53 }
0x1113   :  { %v2542_v58 = vpop.eup %2541 }
0x1114   :  { %v986_v62 = vmul.f32 0.6931472, %v2542_v58 }
0x1116   :  { %v992_v0 = vsel %vm991_vm9, %v989_v63, %v986_v62  ;;  %vm1897_vm9 = vcmask 130160  }
0x1117   :  { %v993_v9 = vadd.f32 %v992_v0, %v977_v8 }
0x1119   :  { %v994_v13 = vsel %vm978_vm10, %v974_v2, %v993_v9 }
0x111a   :  { %v995_v14 = vadd.f32 0.001, %v994_v13 }
0x111c   :  { %v1000_v15 = vmul.f32 %v998_v12, %v995_v14 }
0x111e   :  { %1002 = vrot.lane.b32.xlu1 %v1000_v15, %s2612_s8 }
0x1190   :  { %v1003_v19 = vpop.permute.xlu1 %1002 }
0x1191   :  { %v3085_v21 = vadd.f32 %v1003_v19, %v996_v16 }
0x1193   :  { %1018 = vperm.xlu1 %2501, %v3085_v21   ;;  %1013 = vperm.xlu0 %2500, %v3085_v21  }
0x1197   :  { %1034 = vrot.lane.b32.xlu0 %v1032_v60, %s2607_s1 }
0x120e   :  { %v1019_v22 = vpop.permute.xlu1 %1018  ;;  %v1014_v23 = vpop.permute.xlu0 %1013 }
0x120f   :  { %v1021_v6 = vmul.f32 %v1019_v22, %v2715_v18  ;;  %v1016_v4 = vmul.f32 %v1014_v23, %v2712_v17 }
0x1211   :  { %v1022_v25 = vadd.f32 %v1021_v6, %v1016_v4 }
0x1212   :  { %v1035_v2 = vpop.permute.xlu0 %1034 }
0x1213   :  { %v1023_v26 = vadd.f32 %v1022_v25, %v901_v61  ;;  %v1031_v33 = vadd.f32 %v1022_v25, %v2688_v10 }
0x1215   :  { %v1024_v27 = vadd.f32 %v1023_v26, %v2688_v10 }
0x1217   :  { %v1912_v28 = vmul.f32 -1.442695, %v1024_v27 }
0x1219   :  { %2543 = vpow2.f32 %v1912_v28 }
0x1226   :  { %v2544_v29 = vpop.eup %2543 }
0x1227   :  { %v1028_v30 = vadd.f32 1.0, %v2544_v29 }
0x1229   :  { %2545 = vrcp.f32 %v1028_v30 }
0x1236   :  { %v2546_v31 = vpop.eup %2545 }
0x1237   :  { %v1037_v32 = vmul.f32 %v2546_v31, %v1035_v2  ;;  %v1044_v61 = vsub.f32 1.0, %v2546_v31  ;;  %v1050_v44 = vmul.f32 %v2546_v31, %v3031_v40 }
0x1239   :  { %1039 = vrot.lane.b32.xlu1 %v1037_v32, %s2607_s1 }
0x12ab   :  { %v1040_v38 = vpop.permute.xlu1 %1039 }
0x12ac   :  { %v1042_v41 = vadd.f32 %v1040_v38, %v1031_v33 }
0x12ae   :  { %2547 = vtanh.f32 %v1042_v41 }
0x12bb   :  { %v2548_v46 = vpop.eup %2547 }
0x12bc   :  { %1046 = vrot.lane.b32.xlu0 %v2548_v46, %s2606_s24 }
0x12c0   :  { %1219 = vrot.lane.b32.xlu0 %v2853_v57, %s2614_s12  ;;  %s2623_s12 = smov 14  }
0x132e   :  { %v1047_v3 = vpop.permute.xlu0 %1046 }
0x132f   :  { %v1049_v53 = vmul.f32 %v1047_v3, %v1044_v61 }
0x1331   :  { %v3098_v5 = vadd.f32 %v1050_v44, %v1049_v53 }
0x1332   :  { %v1220_v15 = vpop.permute.xlu0 %1219 }
0x1333   :  { %1053 = vrot.lane.b32.xlu1 %v3098_v5, %s2606_s24 }
0x13a5   :  { %v1054_v58 = vpop.permute.xlu1 %1053 }
0x13a6   :  { %2305 = vmatmul.mubr.msk.f32.vlgmr.msra.gmra.mxu0 %vm37_vm1, %v1054_v58 }
0x13a7   :  { %2308 = vmatpush3.msra.mxu0 %v2726_v34  ;;  %2339 = vmatprep.mubr.msk.f32.mxu0 %vm2605_vm0, %v2604_v1 }
0x13a8   :  { %2309 = vmatprep.subr.mxu0 %v2604_v1 }
0x13a9   :  { %2310 = vmatpush3.msra.mxu0 %v2731_v35 }
0x13aa   :  { %2311 = vmatprep.subr.mxu0 %v2604_v1 }
0x13ab   :  { %2312 = vmatpush3.msra.mxu0 %v2738_v36 }
0x13ac   :  { %2313 = vmatprep.subr.mxu0 %v2604_v1 }
0x13ad   :  { %2314 = vmatpush3.msra.mxu0 %v2745_v37 }
0x13ae   :  { %2315 = vmatprep.subr.mxu0 %v2604_v1 }
0x13af   :  { %2316 = vmatpush3.msra.mxu0 %v2752_v39  ;;  %v3142_v39 = vld [vmem:[%s3465_s2 + $0x20] sm:$0xff] }
0x13b0   :  { %2317 = vmatprep.subr.mxu0 %v2604_v1 }
0x13b1   :  { %2318 = vmatpush3.msra.mxu0 %v2759_v42  ;;  %v3151_v42 = vld [vmem:[%s3465_s2 + $0x18] sm:$0xff] }
0x13b2   :  { %2319 = vmatprep.subr.mxu0 %v2604_v1 }
0x13b3   :  { %2320 = vmatpush3.msra.mxu0 %v2766_v45  ;;  %v3158_v45 = vld [vmem:[%s3465_s2 + $0x10] sm:$0xff] }
0x13b4   :  { %2321 = vmatprep.subr.mxu0 %v2604_v1 }
0x13b5   :  { %2322 = vmatpush3.msra.mxu0 %v2775_v47  ;;  %v3165_v47 = vld [vmem:[%s3465_s2 + $0x8] sm:$0xff] }
0x13b6   :  { %2323 = vmatprep.subr.mxu0 %v2604_v1 }
0x13b7   :  { %2324 = vmatpush3.msra.mxu0 %v2784_v48 }
0x13b8   :  { %2325 = vmatprep.subr.mxu0 %v2604_v1 }
0x13b9   :  { %2326 = vmatpush3.msra.mxu0 %v2791_v49 }
0x13ba   :  { %2327 = vmatprep.subr.mxu0 %v2604_v1 }
0x13bb   :  { %2328 = vmatpush3.msra.mxu0 %v2798_v50 }
0x13bc   :  { %2329 = vmatprep.subr.mxu0 %v2604_v1 }
0x13bd   :  { %2330 = vmatpush3.msra.mxu0 %v2805_v51 }
0x13be   :  { %2331 = vmatprep.subr.mxu0 %v2604_v1 }
0x13bf   :  { %2332 = vmatpush3.msra.mxu0 %v2812_v52 }
0x13c0   :  { %2333 = vmatprep.subr.mxu0 %v2604_v1 }
0x13c1   :  { %2334 = vmatpush3.msra.mxu0 %v2832_v54 }
0x13c2   :  { %2335 = vmatprep.subr.mxu0 %v2604_v1 }
0x13c3   :  { %2336 = vmatpush3.msra.mxu0 %v2839_v55 }
0x13c4   :  { %2337 = vmatprep.subr.mxu0 %v2604_v1 }
0x13c5   :  { %2338 = vmatpush3.msra.mxu0 %v2846_v56 }
0x13c6   :  { %2388 = vmatprep.subr.mxu0 %v2604_v1 }
0x1466   :  { %v1123_v34 = vpop.f32.mrf.mxu0 }
0x1467   :  { %v1127_v35 = vadd.f32 %v1123_v34, %v2859_v59  ;;  %v1254_v6 = vadd.f32 %v1123_v34, %v2705_v11 }
0x1468   :  { %v2306_v36 = vpop.f32.mrf.mxu0 }
0x1469   :  { %v1128_v37 = vmax.f32 %v1127_v35, 0.0 }
0x146b   :  { %2340 = vmatmul.mubr.f32.vlgmr.msra.gmra.mxu0 %v1128_v37 }
0x146c   :  { %2389 = vmatpush3.msra.mxu0 %v3142_v39  ;;  %2396 = vmatprep.mubr.msk.f32.mxu0 %vm2605_vm0, %v2604_v1 }
0x146d   :  { %2390 = vmatprep.subr.mxu0 %v2604_v1 }
0x146e   :  { %2391 = vmatpush3.msra.mxu0 %v3151_v42 }
0x146f   :  { %2392 = vmatprep.subr.mxu0 %v2604_v1 }
0x1470   :  { %2393 = vmatpush3.msra.mxu0 %v3158_v45 }
0x1471   :  { %2394 = vmatprep.subr.mxu0 %v2604_v1 }
0x1472   :  { %2395 = vmatpush3.msra.mxu0 %v3165_v47 }
0x1473   :  { %2399 = vmatprep.subr.mxu0 %v2604_v1 }
0x152b   :  { %v1195_v48 = vpop.f32.mrf.mxu0 }
0x152c   :  { %v1196_v49 = vadd.f32 %v1195_v48, %v2874_v7  ;;  %v3193_v48 = vld [vmem:[%s3465_s2 + $0xa0] sm:$0xff] }
0x152d   :  { %v2341_v50 = vpop.f32.mrf.mxu0 }
0x152e   :  { %v1202_v51 = vand.u32 2147483647, %v1196_v49  ;;  %v1199_v9 = vmax.f32 %v1196_v49, 0.0  ;;  %vm1200_vm12 = vcmp.ne.f32.partialorder %v1196_v49, %v1196_v49  ;;  %v1218_v60 = vadd.f32 %v1196_v49, %v3085_v21  ;;  %v3216_v50 = vld [vmem:[%s3465_s2 + $0x88] sm:$0xff] }
0x1530   :  { %v1203_v52 = vsub.f32 0.0, %v1202_v51  ;;  %v3223_v51 = vld [vmem:[%s3465_s2 + $0x80] sm:$0xff] }
0x1532   :  { %v1204_v54 = vmul.f32 1.442695, %v1203_v52  ;;  %v3230_v52 = vld [vmem:[%s3465_s2 + $0x78] sm:$0xff] }
0x1534   :  { %2549 = vpow2.f32 %v1204_v54  ;;  %v3237_v54 = vld [vmem:[%s3465_s2 + $0x70] sm:$0xff] }
0x1541   :  { %v2550_v55 = vpop.eup %2549 }
0x1542   :  { %v1206_v56 = vadd.f32 1.0, %v2550_v55  ;;  %v1209_v57 = vmul.f32 -0.5, %v2550_v55  ;;  %v1212_v62 = vand.u32 2147483647, %v2550_v55 }
0x1544   :  { %2551 = vlog2.f32 %v1206_v56  ;;  %v1210_v40 = vadd.f32 1.0, %v1209_v57  ;;  %vm1213_vm11 = vcmp.lt.f32.partialorder %v1212_v62, 0.0004427343  ;;  %v3251_v56 = vld [vmem:[%s3465_s2 + $0x60] sm:$0xff]  ;;  %v3258_v57 = vld [vmem:[%s3465_s2 + $0x58] sm:$0xff]  ;;  %v3272_v62 = vld [vmem:[%s3465_s2 + $0x48] sm:$0xff] }
0x1546   :  { %v1211_v0 = vmul.f32 %v2550_v55, %v1210_v40  ;;  %v3244_v55 = vld [vmem:[%s3465_s2 + $0x68] sm:$0xff]  ;;  %v3265_v40 = vld [vmem:[%s3465_s2 + $0x50] sm:$0xff] }
0x1551   :  { %v2552_v63 = vpop.eup %2551 }
0x1552   :  { %v1208_v8 = vmul.f32 0.6931472, %v2552_v63  ;;  %v3279_v63 = vld [vmem:[%s3465_s2 + $0x40] sm:$0xff] }
0x1554   :  { %v1214_v12 = vsel %vm1213_vm11, %v1211_v0, %v1208_v8  ;;  %v3286_v8 = vld [vmem:[%s3465_s2 + $0x38] sm:$0xff]  ;;  %v3293_v0 = vld [vmem:[%s3465_s2 + $0x30] sm:$0xff] }
0x1555   :  { %v1215_v13 = vadd.f32 %v1214_v12, %v1199_v9  ;;  %v3300_v9 = vld [vmem:[%s3465_s2 + $0x28] sm:$0xff]  ;;  %v3307_v12 = vld [vmem:[%s3467_s0] sm:$0xff]  ;;  %s2616_s0 = smov 118  }
0x1557   :  { %v1216_v14 = vsel %vm1200_vm12, %v1196_v49, %v1215_v13  ;;  %v3209_v49 = vld [vmem:[%s3465_s2 + $0x90] sm:$0xff] }
0x1558   :  { %v1217_v16 = vadd.f32 0.001, %v1216_v14 }
0x155a   :  { %v1222_v19 = vmul.f32 %v1220_v15, %v1217_v16 }
0x155c   :  { %1224 = vrot.lane.b32.xlu1 %v1222_v19, %s2612_s8 }
0x15ce   :  { %v1225_v22 = vpop.permute.xlu1 %1224 }
0x15cf   :  { %v3172_v23 = vadd.f32 %v1225_v22, %v1218_v60 }
0x15d1   :  { %1240 = vperm.xlu1 %2501, %v3172_v23   ;;  %1235 = vperm.xlu0 %2500, %v3172_v23  }
0x15d5   :  { %1256 = vrot.lane.b32.xlu0 %v1254_v6, %s2607_s1 }
0x164c   :  { %v1241_v4 = vpop.permute.xlu1 %1240  ;;  %v1236_v25 = vpop.permute.xlu0 %1235 }
0x164d   :  { %v1243_v26 = vmul.f32 %v1241_v4, %v2715_v18  ;;  %v1238_v27 = vmul.f32 %v1236_v25, %v2712_v17 }
0x164f   :  { %v1244_v28 = vadd.f32 %v1243_v26, %v1238_v27 }
0x1650   :  { %v1257_v38 = vpop.permute.xlu0 %1256 }
0x1651   :  { %v1245_v29 = vadd.f32 %v1244_v28, %v1123_v34  ;;  %v1253_v46 = vadd.f32 %v1244_v28, %v2688_v10 }
0x1653   :  { %v1246_v30 = vadd.f32 %v1245_v29, %v2688_v10 }
0x1655   :  { %v1914_v31 = vmul.f32 -1.442695, %v1246_v30 }
0x1657   :  { %2553 = vpow2.f32 %v1914_v31 }
0x1664   :  { %v2554_v2 = vpop.eup %2553 }
0x1665   :  { %v1250_v32 = vadd.f32 1.0, %v2554_v2 }
0x1667   :  { %2555 = vrcp.f32 %v1250_v32 }
0x1674   :  { %v2556_v33 = vpop.eup %2555 }
0x1675   :  { %v1259_v41 = vmul.f32 %v2556_v33, %v1257_v38  ;;  %v1266_v53 = vsub.f32 1.0, %v2556_v33  ;;  %v1272_v34 = vmul.f32 %v2556_v33, %v3098_v5  ;;  %v3202_v5 = vld [vmem:[%s3465_s2 + $0x98] sm:$0xff]  ;;  %s2617_s2 = smov 116  }
0x1677   :  { %1261 = vrot.lane.b32.xlu1 %v1259_v41, %s2607_s1 }
0x16e9   :  { %v1262_v61 = vpop.permute.xlu1 %1261 }
0x16ea   :  { %v1264_v3 = vadd.f32 %v1262_v61, %v1253_v46 }
0x16ec   :  { %2557 = vtanh.f32 %v1264_v3 }
0x16f9   :  { %v2558_v44 = vpop.eup %2557 }
0x16fa   :  { %1268 = vrot.lane.b32.xlu0 %v2558_v44, %s2606_s24 }
0x16fe   :  { %1441 = vrot.lane.b32.xlu0 %v3307_v12, %s2615_s5 }
0x176c   :  { %v1269_v58 = vpop.permute.xlu0 %1268 }
0x176d   :  { %v1271_v35 = vmul.f32 %v1269_v58, %v1266_v53 }
0x176f   :  { %v3185_v36 = vadd.f32 %v1272_v34, %v1271_v35 }
0x1770   :  { %v1442_v32 = vpop.permute.xlu0 %1441 }
0x1771   :  { %1275 = vrot.lane.b32.xlu1 %v3185_v36, %s2606_s24 }
0x17e3   :  { %v1276_v37 = vpop.permute.xlu1 %1275 }
0x17e4   :  { %2351 = vmatmul.mubr.msk.f32.vlgmr.msra.gmra.mxu1 %vm37_vm1, %v1276_v37 }
0x17e5   :  { %2354 = vmatpush3.msra.mxu1 %v3193_v48  ;;  %2385 = vmatprep.mubr.msk.f32.mxu1 %vm2605_vm0, %v2604_v1 }
0x17e6   :  { %2355 = vmatprep.subr.mxu1 %v2604_v1 }
0x17e7   :  { %2356 = vmatpush3.msra.mxu1 %v3202_v5 }
0x17e8   :  { %2357 = vmatprep.subr.mxu1 %v2604_v1 }
0x17e9   :  { %2358 = vmatpush3.msra.mxu1 %v3209_v49 }
0x17ea   :  { %2359 = vmatprep.subr.mxu1 %v2604_v1 }
0x17eb   :  { %2360 = vmatpush3.msra.mxu1 %v3216_v50 }
0x17ec   :  { %2361 = vmatprep.subr.mxu1 %v2604_v1 }
0x17ed   :  { %2362 = vmatpush3.msra.mxu1 %v3223_v51 }
0x17ee   :  { %2363 = vmatprep.subr.mxu1 %v2604_v1 }
0x17ef   :  { %2364 = vmatpush3.msra.mxu1 %v3230_v52 }
0x17f0   :  { %2365 = vmatprep.subr.mxu1 %v2604_v1 }
0x17f1   :  { %2366 = vmatpush3.msra.mxu1 %v3237_v54 }
0x17f2   :  { %2367 = vmatprep.subr.mxu1 %v2604_v1 }
0x17f3   :  { %2368 = vmatpush3.msra.mxu1 %v3244_v55 }
0x17f4   :  { %2369 = vmatprep.subr.mxu1 %v2604_v1 }
0x17f5   :  { %2370 = vmatpush3.msra.mxu1 %v3251_v56 }
0x17f6   :  { %2371 = vmatprep.subr.mxu1 %v2604_v1 }
0x17f7   :  { %2372 = vmatpush3.msra.mxu1 %v3258_v57 }
0x17f8   :  { %2373 = vmatprep.subr.mxu1 %v2604_v1 }
0x17f9   :  { %2374 = vmatpush3.msra.mxu1 %v3265_v40 }
0x17fa   :  { %2375 = vmatprep.subr.mxu1 %v2604_v1 }
0x17fb   :  { %2376 = vmatpush3.msra.mxu1 %v3272_v62 }
0x17fc   :  { %2377 = vmatprep.subr.mxu1 %v2604_v1 }
0x17fd   :  { %2378 = vmatpush3.msra.mxu1 %v3279_v63 }
0x17fe   :  { %2379 = vmatprep.subr.mxu1 %v2604_v1 }
0x17ff   :  { %2380 = vmatpush3.msra.mxu1 %v3286_v8 }
0x1800   :  { %2381 = vmatprep.subr.mxu1 %v2604_v1 }
0x1801   :  { %2382 = vmatpush3.msra.mxu1 %v3293_v0 }
0x1802   :  { %2383 = vmatprep.subr.mxu1 %v2604_v1 }
0x1803   :  { %2384 = vmatpush3.msra.mxu1 %v3300_v9 }
0x1804   :  { %2434 = vmatprep.subr.mxu1 %v2604_v1 }
0x18a4   :  { %v1345_v13 = vpop.f32.mrf.mxu1 }
0x18a5   :  { %v1349_v14 = vadd.f32 %v1345_v13, %v2859_v59  ;;  %v1476_v44 = vadd.f32 %v1345_v13, %v2705_v11 }
0x18a6   :  { %v2352_v15 = vpop.f32.mrf.mxu1 }
0x18a7   :  { %v1350_v16 = vmax.f32 %v1349_v14, 0.0 }
0x18a9   :  { %2386 = vmatmul.mubr.f32.vlgmr.msra.gmra.mxu1 %v1350_v16 }
0x18aa   :  { %2435 = vmatpush3.msra.mxu1 %v3142_v39  ;;  %2442 = vmatprep.mubr.msk.f32.mxu1 %vm2605_vm0, %v2604_v1 }
0x18ab   :  { %2436 = vmatprep.subr.mxu1 %v2604_v1 }
0x18ac   :  { %2437 = vmatpush3.msra.mxu1 %v3151_v42 }
0x18ad   :  { %2438 = vmatprep.subr.mxu1 %v2604_v1 }
0x18ae   :  { %2439 = vmatpush3.msra.mxu1 %v3158_v45 }
0x18af   :  { %2440 = vmatprep.subr.mxu1 %v2604_v1 }
0x18b0   :  { %2441 = vmatpush3.msra.mxu1 %v3165_v47 }
0x18b1   :  { %2445 = vmatprep.subr.mxu1 %v2604_v1 }
0x1969   :  { %v1417_v19 = vpop.f32.mrf.mxu1 }
0x196a   :  { %v1418_v39 = vadd.f32 %v1417_v19, %v2874_v7 }
0x196b   :  { %v2387_v60 = vpop.f32.mrf.mxu1 }
0x196c   :  { %v1424_v22 = vand.u32 2147483647, %v1418_v39  ;;  %v1421_v47 = vmax.f32 %v1418_v39, 0.0  ;;  %vm1422_vm14 = vcmp.ne.f32.partialorder %v1418_v39, %v1418_v39  ;;  %v1440_v46 = vadd.f32 %v1418_v39, %v3172_v23 }
0x196e   :  { %v1425_v6 = vsub.f32 0.0, %v1424_v22 }
0x1970   :  { %v1426_v4 = vmul.f32 1.442695, %v1425_v6 }
0x1972   :  { %2559 = vpow2.f32 %v1426_v4 }
0x197f   :  { %v2560_v25 = vpop.eup %2559 }
0x1980   :  { %v1428_v42 = vadd.f32 1.0, %v2560_v25  ;;  %v1431_v26 = vmul.f32 -0.5, %v2560_v25  ;;  %v1434_v45 = vand.u32 2147483647, %v2560_v25 }
0x1982   :  { %2561 = vlog2.f32 %v1428_v42  ;;  %v1432_v27 = vadd.f32 1.0, %v1431_v26  ;;  %vm1435_vm13 = vcmp.lt.f32.partialorder %v1434_v45, 0.0004427343 }
0x1984   :  { %v1433_v30 = vmul.f32 %v2560_v25, %v1432_v27 }
0x198f   :  { %v2562_v28 = vpop.eup %2561 }
0x1990   :  { %v1430_v29 = vmul.f32 0.6931472, %v2562_v28 }
0x1992   :  { %v1436_v31 = vsel %vm1435_vm13, %v1433_v30, %v1430_v29 }
0x1993   :  { %v1437_v2 = vadd.f32 %v1436_v31, %v1421_v47 }
0x1995   :  { %v1438_v33 = vsel %vm1422_vm14, %v1418_v39, %v1437_v2 }
0x1996   :  { %v1439_v38 = vadd.f32 0.001, %v1438_v33 }
0x1998   :  { %v1444_v41 = vmul.f32 %v1442_v32, %v1439_v38 }
0x199a   :  { %1446 = vrot.lane.b32.xlu1 %v1444_v41, %s2612_s8 }
0x1a0c   :  { %v1447_v61 = vpop.permute.xlu1 %1446 }
0x1a0d   :  { %v3324_v3 = vadd.f32 %v1447_v61, %v1440_v46 }
0x1a0f   :  { %1462 = vperm.xlu1 %2501, %v3324_v3   ;;  %1457 = vperm.xlu0 %2500, %v3324_v3  }
0x1a13   :  { %1478 = vrot.lane.b32.xlu0 %v1476_v44, %s2607_s1 }
0x1a8a   :  { %v1463_v53 = vpop.permute.xlu1 %1462  ;;  %v1458_v58 = vpop.permute.xlu0 %1457 }
0x1a8b   :  { %v1465_v34 = vmul.f32 %v1463_v53, %v2715_v18  ;;  %v1460_v35 = vmul.f32 %v1458_v58, %v2712_v17 }
0x1a8d   :  { %v1466_v37 = vadd.f32 %v1465_v34, %v1460_v35 }
0x1a8e   :  { %v1479_v22 = vpop.permute.xlu0 %1478 }
0x1a8f   :  { %v1467_v14 = vadd.f32 %v1466_v37, %v1345_v13  ;;  %v1475_v4 = vadd.f32 %v1466_v37, %v2688_v10 }
0x1a91   :  { %v1468_v15 = vadd.f32 %v1467_v14, %v2688_v10 }
0x1a93   :  { %v1916_v16 = vmul.f32 -1.442695, %v1468_v15 }
0x1a95   :  { %2563 = vpow2.f32 %v1916_v16 }
0x1aa2   :  { %v2564_v19 = vpop.eup %2563 }
0x1aa3   :  { %v1472_v39 = vadd.f32 1.0, %v2564_v19 }
0x1aa5   :  { %2565 = vrcp.f32 %v1472_v39 }
0x1ab2   :  { %v2566_v60 = vpop.eup %2565 }
0x1ab3   :  { %v1481_v6 = vmul.f32 %v2566_v60, %v1479_v22  ;;  %v1488_v13 = vsub.f32 1.0, %v2566_v60  ;;  %v1494_v45 = vmul.f32 %v2566_v60, %v3185_v36 }
0x1ab5   :  { %1483 = vrot.lane.b32.xlu1 %v1481_v6, %s2607_s1 }
0x1b27   :  { %v1484_v25 = vpop.permute.xlu1 %1483 }
0x1b28   :  { %v1486_v42 = vadd.f32 %v1484_v25, %v1475_v4 }
0x1b2a   :  { %2567 = vtanh.f32 %v1486_v42 }
0x1b37   :  { %v2568_v26 = vpop.eup %2567 }
0x1b38   :  { %1490 = vrot.lane.b32.xlu0 %v2568_v26, %s2606_s24 }
0x1b3c   :  { %1663 = vrot.lane.b32.xlu0 %v3307_v12, %s2616_s0 }
0x1baa   :  { %v1491_v27 = vpop.permute.xlu0 %1490 }
0x1bab   :  { %v1493_v28 = vmul.f32 %v1491_v27, %v1488_v13 }
0x1bad   :  { %v3337_v29 = vadd.f32 %v1494_v45, %v1493_v28 }
0x1bae   :  { %v1664_v22 = vpop.permute.xlu0 %1663 }
0x1baf   :  { %1497 = vrot.lane.b32.xlu1 %v3337_v29, %s2606_s24 }
0x1c21   :  { %v1498_v30 = vpop.permute.xlu1 %1497 }
0x1c22   :  { %2397 = vmatmul.mubr.msk.f32.vlgmr.msra.gmra.mxu0 %vm37_vm1, %v1498_v30 }
0x1c23   :  { %2400 = vmatpush3.msra.mxu0 %v3193_v48  ;;  %2431 = vmatprep.mubr.msk.f32.mxu0 %vm2605_vm0, %v2604_v1 }
0x1c24   :  { %2401 = vmatprep.subr.mxu0 %v2604_v1 }
0x1c25   :  { %2402 = vmatpush3.msra.mxu0 %v3202_v5 }
0x1c26   :  { %2403 = vmatprep.subr.mxu0 %v2604_v1 }
0x1c27   :  { %2404 = vmatpush3.msra.mxu0 %v3209_v49 }
0x1c28   :  { %2405 = vmatprep.subr.mxu0 %v2604_v1 }
0x1c29   :  { %2406 = vmatpush3.msra.mxu0 %v3216_v50 }
0x1c2a   :  { %2407 = vmatprep.subr.mxu0 %v2604_v1 }
0x1c2b   :  { %2408 = vmatpush3.msra.mxu0 %v3223_v51 }
0x1c2c   :  { %2409 = vmatprep.subr.mxu0 %v2604_v1 }
0x1c2d   :  { %2410 = vmatpush3.msra.mxu0 %v3230_v52 }
0x1c2e   :  { %2411 = vmatprep.subr.mxu0 %v2604_v1 }
0x1c2f   :  { %2412 = vmatpush3.msra.mxu0 %v3237_v54 }
0x1c30   :  { %2413 = vmatprep.subr.mxu0 %v2604_v1 }
0x1c31   :  { %2414 = vmatpush3.msra.mxu0 %v3244_v55 }
0x1c32   :  { %2415 = vmatprep.subr.mxu0 %v2604_v1 }
0x1c33   :  { %2416 = vmatpush3.msra.mxu0 %v3251_v56 }
0x1c34   :  { %2417 = vmatprep.subr.mxu0 %v2604_v1 }
0x1c35   :  { %2418 = vmatpush3.msra.mxu0 %v3258_v57 }
0x1c36   :  { %2419 = vmatprep.subr.mxu0 %v2604_v1 }
0x1c37   :  { %2420 = vmatpush3.msra.mxu0 %v3265_v40 }
0x1c38   :  { %2421 = vmatprep.subr.mxu0 %v2604_v1 }
0x1c39   :  { %2422 = vmatpush3.msra.mxu0 %v3272_v62 }
0x1c3a   :  { %2423 = vmatprep.subr.mxu0 %v2604_v1 }
0x1c3b   :  { %2424 = vmatpush3.msra.mxu0 %v3279_v63 }
0x1c3c   :  { %2425 = vmatprep.subr.mxu0 %v2604_v1 }
0x1c3d   :  { %2426 = vmatpush3.msra.mxu0 %v3286_v8 }
0x1c3e   :  { %2427 = vmatprep.subr.mxu0 %v2604_v1 }
0x1c3f   :  { %2428 = vmatpush3.msra.mxu0 %v3293_v0 }
0x1c40   :  { %2429 = vmatprep.subr.mxu0 %v2604_v1 }
0x1c41   :  { %2430 = vmatpush3.msra.mxu0 %v3300_v9 }
0x1ce2   :  { %v1567_v36 = vpop.f32.mrf.mxu0 }
0x1ce3   :  { %v1571_v47 = vadd.f32 %v1567_v36, %v2859_v59  ;;  %v1698_v13 = vadd.f32 %v1567_v36, %v2705_v11 }
0x1ce4   :  { %v2398_v31 = vpop.f32.mrf.mxu0 }
0x1ce5   :  { %v1572_v2 = vmax.f32 %v1571_v47, 0.0 }
0x1ce7   :  { %2432 = vmatmul.mubr.f32.vlgmr.msra.gmra.mxu0 %v1572_v2 }
0x1da7   :  { %v1639_v32 = vpop.f32.mrf.mxu0 }
0x1da8   :  { %v1640_v33 = vadd.f32 %v1639_v32, %v2874_v7 }
0x1da9   :  { %v2433_v38 = vpop.f32.mrf.mxu0 }
0x1daa   :  { %v1646_v41 = vand.u32 2147483647, %v1640_v33  ;;  %v1643_v16 = vmax.f32 %v1640_v33, 0.0  ;;  %vm1644_vm2 = vcmp.ne.f32.partialorder %v1640_v33, %v1640_v33  ;;  %v1662_v25 = vadd.f32 %v1640_v33, %v3324_v3 }
0x1dac   :  { %v1647_v46 = vsub.f32 0.0, %v1646_v41 }
0x1dae   :  { %v1648_v61 = vmul.f32 1.442695, %v1647_v46 }
0x1db0   :  { %2569 = vpow2.f32 %v1648_v61 }
0x1dbd   :  { %v2570_v44 = vpop.eup %2569 }
0x1dbe   :  { %v1650_v53 = vadd.f32 1.0, %v2570_v44  ;;  %v1653_v58 = vmul.f32 -0.5, %v2570_v44  ;;  %v1656_v35 = vand.u32 2147483647, %v2570_v44 }
0x1dc0   :  { %2571 = vlog2.f32 %v1650_v53  ;;  %v1654_v34 = vadd.f32 1.0, %v1653_v58  ;;  %vm1657_vm15 = vcmp.lt.f32.partialorder %v1656_v35, 0.0004427343 }
0x1dc2   :  { %v1655_v15 = vmul.f32 %v2570_v44, %v1654_v34 }
0x1dcd   :  { %v2572_v37 = vpop.eup %2571 }
0x1dce   :  { %v1652_v14 = vmul.f32 0.6931472, %v2572_v37 }
0x1dd0   :  { %v1658_v19 = vsel %vm1657_vm15, %v1655_v15, %v1652_v14 }
0x1dd1   :  { %v1659_v39 = vadd.f32 %v1658_v19, %v1643_v16 }
0x1dd3   :  { %v1660_v60 = vsel %vm1644_vm2, %v1640_v33, %v1659_v39 }
0x1dd4   :  { %v1661_v6 = vadd.f32 0.001, %v1660_v60 }
0x1dd6   :  { %v1666_v4 = vmul.f32 %v1664_v22, %v1661_v6 }
0x1dd8   :  { %1668 = vrot.lane.b32.xlu1 %v1666_v4, %s2612_s8 }
0x1e4a   :  { %v1669_v42 = vpop.permute.xlu1 %1668 }
0x1e4b   :  { %v3380_v26 = vadd.f32 %v1669_v42, %v1662_v25 }
0x1e4d   :  { %1684 = vperm.xlu1 %2501, %v3380_v26   ;;  %1679 = vperm.xlu0 %2500, %v3380_v26  }
0x1e51   :  { %1700 = vrot.lane.b32.xlu0 %v1698_v13, %s2607_s1 }
0x1e52   :  { %2502 = vset.pattern.permute.xlu0 %v2610_v24 }
0x1ec8   :  { %v1685_v27 = vpop.permute.xlu1 %1684  ;;  %v1680_v45 = vpop.permute.xlu0 %1679 }
0x1ec9   :  { %v1687_v28 = vmul.f32 %v1685_v27, %v2715_v18  ;;  %v1682_v30 = vmul.f32 %v1680_v45, %v2712_v17 }
0x1ecb   :  { %v1688_v47 = vadd.f32 %v1687_v28, %v1682_v30 }
0x1ecc   :  { %v1701_v41 = vpop.permute.xlu0 %1700 }
0x1ecd   :  { %v1689_v31 = vadd.f32 %v1688_v47, %v1567_v36  ;;  %v1697_v24 = vadd.f32 %v1688_v47, %v2688_v10 }
0x1ecf   :  { %v1690_v2 = vadd.f32 %v1689_v31, %v2688_v10 }
0x1ed1   :  { %v1918_v32 = vmul.f32 -1.442695, %v1690_v2 }
0x1ed3   :  { %2573 = vpow2.f32 %v1918_v32 }
0x1ee0   :  { %v2574_v33 = vpop.eup %2573 }
0x1ee1   :  { %v1694_v38 = vadd.f32 1.0, %v2574_v33 }
0x1ee3   :  { %2575 = vrcp.f32 %v1694_v38 }
0x1ef0   :  { %v2576_v11 = vpop.eup %2575 }
0x1ef1   :  { %v1703_v46 = vmul.f32 %v2576_v11, %v1701_v41  ;;  %v1710_v36 = vsub.f32 1.0, %v2576_v11  ;;  %v1716_v44 = vmul.f32 %v2576_v11, %v3337_v29 }
0x1ef3   :  { %1705 = vrot.lane.b32.xlu1 %v1703_v46, %s2607_s1 }
0x1f65   :  { %v1706_v61 = vpop.permute.xlu1 %1705 }
0x1f66   :  { %v1708_v18 = vadd.f32 %v1706_v61, %v1697_v24 }
0x1f68   :  { %2577 = vtanh.f32 %v1708_v18 }
0x1f75   :  { %v2578_v17 = vpop.eup %2577 }
0x1f76   :  { %1712 = vrot.lane.b32.xlu0 %v2578_v17, %s2606_s24 }
0x1f7a   :  { %1884 = vrot.lane.b32.xlu0 %v3307_v12, %s2617_s2 }
0x1f7e   :  { %563 = vrot.lane.b32.xlu0 %v2950_v20, %s2609_s7 }
0x1f82   :  { %1007 = vrot.lane.b32.xlu0 %v3085_v21, %s2618_s6 }
0x1f86   :  { %1451 = vrot.lane.b32.xlu0 %v3324_v3, %s2619_s9 }
0x1fe8   :  { %v1713_v10 = vpop.permute.xlu0 %1712 }
0x1fe9   :  { %v1715_v53 = vmul.f32 %v1713_v10, %v1710_v36 }
0x1feb   :  { %v1717_v58 = vadd.f32 %v1716_v44, %v1715_v53 }
0x1fec   :  { %v3399_v34 = vpop.permute.xlu0 %1884 }
0x1fed   :  { %1719 = vrot.lane.b32.xlu1 %v1717_v58, %s2606_s24  ;;  %s2620_s24 = smov 4  }
0x1ff0   :  { %v564_v12 = vpop.permute.xlu0 %563 }
0x1ff1   :  { %567 = vst.msk [vmem:[%s3468_s3] sm:$0xff] %vm566_vm3, %v564_v12 }
0x1ff4   :  { %v1008_v19 = vpop.permute.xlu0 %1007 }
0x205f   :  { %v1720_v20 = vpop.permute.xlu1 %1719 }
0x2060   :  { %2443 = vmatmul.mubr.msk.f32.vlgmr.msra.gmra.mxu1 %vm37_vm1, %v1720_v20 }
0x2061   :  { %2446 = vmatpush3.msra.mxu1 %v3193_v48  ;;  %2477 = vmatprep.mubr.msk.f32.mxu1 %vm2605_vm0, %v2604_v1 }
0x2062   :  { %2447 = vmatprep.subr.mxu1 %v2604_v1 }
0x2063   :  { %2448 = vmatpush3.msra.mxu1 %v3202_v5 }
0x2064   :  { %2449 = vmatprep.subr.mxu1 %v2604_v1 }
0x2065   :  { %2450 = vmatpush3.msra.mxu1 %v3209_v49 }
0x2066   :  { %2451 = vmatprep.subr.mxu1 %v2604_v1 }
0x2067   :  { %2452 = vmatpush3.msra.mxu1 %v3216_v50 }
0x2068   :  { %2453 = vmatprep.subr.mxu1 %v2604_v1 }
0x2069   :  { %2454 = vmatpush3.msra.mxu1 %v3223_v51 }
0x206a   :  { %2455 = vmatprep.subr.mxu1 %v2604_v1 }
0x206b   :  { %2456 = vmatpush3.msra.mxu1 %v3230_v52 }
0x206c   :  { %2457 = vmatprep.subr.mxu1 %v2604_v1 }
0x206d   :  { %2458 = vmatpush3.msra.mxu1 %v3237_v54 }
0x206e   :  { %2459 = vmatprep.subr.mxu1 %v2604_v1 }
0x206f   :  { %2460 = vmatpush3.msra.mxu1 %v3244_v55 }
0x2070   :  { %2461 = vmatprep.subr.mxu1 %v2604_v1 }
0x2071   :  { %2462 = vmatpush3.msra.mxu1 %v3251_v56 }
0x2072   :  { %2463 = vmatprep.subr.mxu1 %v2604_v1 }
0x2073   :  { %2464 = vmatpush3.msra.mxu1 %v3258_v57 }
0x2074   :  { %2465 = vmatprep.subr.mxu1 %v2604_v1 }
0x2075   :  { %2466 = vmatpush3.msra.mxu1 %v3265_v40 }
0x2076   :  { %2467 = vmatprep.subr.mxu1 %v2604_v1 }
0x2077   :  { %2468 = vmatpush3.msra.mxu1 %v3272_v62 }
0x2078   :  { %2469 = vmatprep.subr.mxu1 %v2604_v1 }
0x2079   :  { %2470 = vmatpush3.msra.mxu1 %v3279_v63 }
0x207a   :  { %2471 = vmatprep.subr.mxu1 %v2604_v1 }
0x207b   :  { %2472 = vmatpush3.msra.mxu1 %v3286_v8 }
0x207c   :  { %2473 = vmatprep.subr.mxu1 %v2604_v1 }
0x207d   :  { %2474 = vmatpush3.msra.mxu1 %v3293_v0 }
0x207e   :  { %2475 = vmatprep.subr.mxu1 %v2604_v1 }
0x207f   :  { %2476 = vmatpush3.msra.mxu1 %v3300_v9 }
0x2120   :  { %v1789_v21 = vpop.f32.mrf.mxu1 }
0x2121   :  { %v1790_v48 = vadd.f32 %v1789_v21, %v2859_v59 }
0x2122   :  { %v2444_v5 = vpop.f32.mrf.mxu1 }
0x2123   :  { %v1793_v49 = vmax.f32 %v1790_v48, 0.0 }
0x2125   :  { %2478 = vmatmul.mubr.f32.vlgmr.msra.gmra.mxu1 %v1793_v49 }
0x21e5   :  { %v1860_v50 = vpop.f32.mrf.mxu1 }
0x21e6   :  { %v1861_v51 = vadd.f32 %v1860_v50, %v2874_v7 }
0x21e7   :  { %v2479_v52 = vpop.f32.mrf.mxu1 }
0x21e8   :  { %v1867_v54 = vand.u32 2147483647, %v1861_v51  ;;  %v1864_v9 = vmax.f32 %v1861_v51, 0.0  ;;  %vm1865_vm1 = vcmp.ne.f32.partialorder %v1861_v51, %v1861_v51  ;;  %v1883_v14 = vadd.f32 %v1861_v51, %v3380_v26 }
0x21ea   :  { %v1868_v55 = vsub.f32 0.0, %v1867_v54 }
0x21ec   :  { %v1869_v56 = vmul.f32 1.442695, %v1868_v55 }
0x21ee   :  { %2579 = vpow2.f32 %v1869_v56 }
0x21fb   :  { %v2580_v57 = vpop.eup %2579 }
0x21fc   :  { %v1871_v40 = vadd.f32 1.0, %v2580_v57  ;;  %v1874_v1 = vmul.f32 -0.5, %v2580_v57  ;;  %v1877_v63 = vand.u32 2147483647, %v2580_v57 }
0x21fe   :  { %2581 = vlog2.f32 %v1871_v40  ;;  %v1875_v62 = vadd.f32 1.0, %v1874_v1  ;;  %vm1878_vm0 = vcmp.lt.f32.partialorder %v1877_v63, 0.0004427343 }
0x2200   :  { %v1876_v59 = vmul.f32 %v2580_v57, %v1875_v62 }
0x220b   :  { %v2582_v8 = vpop.eup %2581 }
0x220c   :  { %v1873_v0 = vmul.f32 0.6931472, %v2582_v8 }
0x220e   :  { %v1879_v3 = vsel %vm1878_vm0, %v1876_v59, %v1873_v0 }
0x220f   :  { %v1880_v29 = vadd.f32 %v1879_v3, %v1864_v9 }
0x2211   :  { %v1881_v7 = vsel %vm1865_vm1, %v1861_v51, %v1880_v29 }
0x2212   :  { %v1882_v35 = vadd.f32 0.001, %v1881_v7 }
0x2214   :  { %v1887_v37 = vmul.f32 %v3399_v34, %v1882_v35 }
0x2216   :  { %1889 = vrot.lane.b32.xlu1 %v1887_v37, %s2612_s8 }
0x221a   :  { %785 = vrot.lane.b32.xlu1 %v3018_v43, %s2620_s24 }
0x221e   :  { %1229 = vrot.lane.b32.xlu1 %v3172_v23, %s2621_s10  ;;  %v1452_v23 = vpop.permute.xlu0 %1451 }
0x2222   :  { %1673 = vrot.lane.b32.xlu1 %v3380_v26, %s2622_s11 }
0x2288   :  { %v1890_v15 = vpop.permute.xlu1 %1889 }
0x2289   :  { %v1892_v16 = vadd.f32 %v1890_v15, %v1883_v14 }
0x228b   :  { %1894 = vrot.lane.b32.xlu0 %v1892_v16, %s2623_s12 }
0x228c   :  { %v786_v39 = vpop.permute.xlu1 %785 }
0x228d   :  { %789 = vst.msk [vmem:[%s3468_s3] sm:$0xff] %vm788_vm4, %v786_v39 }
0x228e   :  { %1011 = vst.msk [vmem:[%s3468_s3] sm:$0xff] %vm1010_vm5, %v1008_v19 }
0x2290   :  { %v1230_v43 = vpop.permute.xlu1 %1229 }
0x2291   :  { %1233 = vst.msk [vmem:[%s3468_s3] sm:$0xff] %vm1232_vm6, %v1230_v43 }
0x2292   :  { %1455 = vst.msk [vmem:[%s3468_s3] sm:$0xff] %vm1454_vm7, %v1452_v23 }
0x2294   :  { %v1674_v60 = vpop.permute.xlu1 %1673 }
0x2295   :  { %1677 = vst.msk [vmem:[%s3468_s3] sm:$0xff] %vm1676_vm8, %v1674_v60 }
0x22fd   :  { %v1895_v22 = vpop.permute.xlu0 %1894 }
0x22fe   :  { %1898 = vst.msk [vmem:[%s3468_s3] sm:$0xff] %vm1897_vm9, %v1895_v22 }

</bundles_post_ra>
